<compile_context>
chip_gen: v7x
topology: tpu7x:2x2x1
jax: 0.10.0
libtpu: 0.0.40
codegen_flags: <defaults>
</compile_context>

<pallas_src>
import math

import jax
import jax.numpy as jnp
from jax import lax
from jax.experimental import pallas as pl
from jax.experimental.pallas import tpu as pltpu

D_MODEL = 256          # config.d_model (module default)
N_MESSAGE_TYPES = 6    # config.n_message_types
N_FEAT = 16            # position(3) + velocity(3) + metadata(5), zero-padded to 16
ROWS_PER_BLOCK = 128   # messages processed per grid step


def v2i_embed_kernel(idx_ref, feat_ref, emb_ref, wc_ref, wo_ref, b_ref, out_ref):
    d = emb_ref.shape[1]            # d_model
    rows = idx_ref.shape[0]
    n_types = emb_ref.shape[0]

    # Embedding lookup as a one-hot matmul: E[idx] == onehot(idx) @ E.
    onehot = (idx_ref[...] ==
              lax.broadcasted_iota(jnp.int32, (rows, n_types), 1)).astype(jnp.float32)
    type_emb = jnp.dot(onehot, emb_ref[...],
                       preferred_element_type=jnp.float32)              # (R, d)

    # Fused position/velocity/metadata projections (block-diagonal weight).
    cont_emb = jnp.dot(feat_ref[...], wc_ref[...],
                       preferred_element_type=jnp.float32)              # (R, 3d)

    # output_proj applied segment-wise -> no (R, 4d) concat.  Row slices of the
    # packed W_o^T are static and sublane-aligned (d is a multiple of 8).
    out = jnp.dot(type_emb, wo_ref[0:d, :], preferred_element_type=jnp.float32)
    out = out + jnp.dot(cont_emb, wo_ref[d:, :], preferred_element_type=jnp.float32)
    out = out + b_ref[...]          # all biases folded into one (1, d) row
    out_ref[...] = out.astype(out_ref.dtype)


def v2i_message_embedding_forward(message_type, position, velocity, metadata, params,
                                  rows_per_block=ROWS_PER_BLOCK):
    f32 = jnp.float32
    lead_shape = message_type.shape                    # e.g. (B, S)
    D = params['emb'].shape[1]
    n_types = params['emb'].shape[0]
    N = int(math.prod(lead_shape))

    # ---- input flattening / packing (layout plumbing only) ----
    idx = message_type.reshape(N, 1).astype(jnp.int32)
    feat = jnp.concatenate(
        [position.reshape(N, 3).astype(f32),
         velocity.reshape(N, 3).astype(f32),
         metadata.reshape(N, 5).astype(f32),
         jnp.zeros((N, N_FEAT - 11), f32)], axis=-1)   # (N, 16)

    # ---- weight packing + exact algebraic bias folding (done once per call) ----
    wo_t = params['wo'].T.astype(f32)                  # (4D, D)
    wc = jnp.zeros((N_FEAT, 3 * D), f32)               # block-diagonal fused weight
    wc = wc.at[0:3, 0:D].set(params['wp'].T)
    wc = wc.at[3:6, D:2 * D].set(params['wv'].T)
    wc = wc.at[6:11, 2 * D:3 * D].set(params['wm'].T)
    b_cont = jnp.concatenate([params['bp'], params['bv'], params['bm']]).astype(f32)
    b_final = (b_cont @ wo_t[D:, :] + params['bo']).reshape(1, D).astype(f32)
    emb_tbl = params['emb'].astype(f32)                # (6, D)

    # ---- row tiling (pad rows so the grid tiles evenly) ----
    R = min(rows_per_block, max(8, -(-N // 8) * 8))
    n_blocks = -(-N // R)
    n_pad = n_blocks * R
    if n_pad != N:
        pad = n_pad - N
        idx = jnp.concatenate([idx, jnp.zeros((pad, 1), jnp.int32)], axis=0)
        feat = jnp.concatenate([feat, jnp.zeros((pad, N_FEAT), f32)], axis=0)

    row_map = lambda i: (i, 0)
    full_map = lambda i: (0, 0)     # weights: constant block index -> loaded once

    out = pl.pallas_call(
        v2i_embed_kernel,
        out_shape=jax.ShapeDtypeStruct((n_pad, D), f32),
        grid_spec=pltpu.PrefetchScalarGridSpec(
            num_scalar_prefetch=0,
            grid=(n_blocks,),
            in_specs=[
                pl.BlockSpec((R, 1), row_map),          # message_type indices
                pl.BlockSpec((R, N_FEAT), row_map),     # packed continuous features
                pl.BlockSpec((n_types, D), full_map),   # embedding table
                pl.BlockSpec((N_FEAT, 3 * D), full_map),  # fused pos/vel/meta weight
                pl.BlockSpec((4 * D, D), full_map),     # output_proj W^T (packed)
                pl.BlockSpec((1, D), full_map),         # folded bias
            ],
            out_specs=pl.BlockSpec((R, D), row_map),
        ),
        compiler_params=pltpu.CompilerParams(
            dimension_semantics=("parallel",)),
    )(idx, feat, emb_tbl, wc, wo_t, b_final)

    return out[:N].reshape(*lead_shape, D)


def ref_forward(message_type, position, velocity, metadata, p):
    """Pure-JAX reference mirroring the PyTorch forward exactly."""
    type_emb = p['emb'][message_type]
    pos_emb = position @ p['wp'].T + p['bp']
    vel_emb = velocity @ p['wv'].T + p['bv']
    meta_emb = metadata @ p['wm'].T + p['bm']
    combined = jnp.concatenate([type_emb, pos_emb, vel_emb, meta_emb], axis=-1)
    return combined @ p['wo'].T + p['bo']


if __name__ == "__main__":
    B, S, D = 4, 64, D_MODEL
    key = jax.random.PRNGKey(0)
    ks = jax.random.split(key, 13)

    # Deterministic synthetic parameters (shapes from the module __init__).
    params = dict(
        emb=jax.random.normal(ks[0], (N_MESSAGE_TYPES, D), jnp.float32) * 0.1,
        wp=jax.random.normal(ks[1], (D, 3), jnp.float32) * 0.1,   # Linear(3, d_model)
        bp=jax.random.normal(ks[2], (D,), jnp.float32) * 0.1,
        wv=jax.random.normal(ks[3], (D, 3), jnp.float32) * 0.1,   # Linear(3, d_model)
        bv=jax.random.normal(ks[4], (D,), jnp.float32) * 0.1,
        wm=jax.random.normal(ks[5], (D, 5), jnp.float32) * 0.1,   # Linear(5, d_model)
        bm=jax.random.normal(ks[6], (D,), jnp.float32) * 0.1,
        wo=jax.random.normal(ks[7], (D, 4 * D), jnp.float32) * 0.05,  # Linear(4d, d)
        bo=jax.random.normal(ks[8], (D,), jnp.float32) * 0.05,
    )

    message_type = jax.random.randint(ks[9], (B, S), 0, N_MESSAGE_TYPES)
    position = jax.random.normal(ks[10], (B, S, 3), jnp.float32) * 2.0
    velocity = jax.random.normal(ks[11], (B, S, 3), jnp.float32)
    metadata = jax.random.normal(ks[12], (B, S, 5), jnp.float32)

    out = v2i_message_embedding_forward(message_type, position, velocity, metadata, params)
    out = jax.block_until_ready(out)

    ref = ref_forward(message_type, position, velocity, metadata, params)
    assert out.shape == (B, S, D)
    assert jnp.allclose(out, ref, atol=1e-4, rtol=1e-4), \
        float(jnp.max(jnp.abs(out - ref)))
    print("KERNEL_OK")
</pallas_src>

<mosaic_0001>
module attributes {stable_mosaic.version = 11 : i64} {
  func.func @v2i_embed_kernel(%arg0: i32, %arg1: memref<128x1xi32, #tpu.memory_space<vmem>>, %arg2: memref<128x16xf32, #tpu.memory_space<vmem>>, %arg3: memref<6x256xf32, #tpu.memory_space<vmem>>, %arg4: memref<16x768xf32, #tpu.memory_space<vmem>>, %arg5: memref<1024x256xf32, #tpu.memory_space<vmem>>, %arg6: memref<1x256xf32, #tpu.memory_space<vmem>>, %arg7: memref<128x256xf32, #tpu.memory_space<vmem>>) attributes {dimension_semantics = [#tpu.dimension_semantics<parallel>], iteration_bounds = array<i64: 2>, scalar_prefetch = 0 : i64, scratch_operands = 0 : i64, tpu.core_type = #tpu.core_type<tc>, window_params = [{transform_indices = @transform_0, window_bounds = array<i64: 128, 1>}, {transform_indices = @transform_1, window_bounds = array<i64: 128, 16>}, {pipeline_mode = #tpu.pipeline_mode<synchronous>, transform_indices = @transform_2, window_bounds = array<i64: 6, 256>}, {pipeline_mode = #tpu.pipeline_mode<synchronous>, transform_indices = @transform_3, window_bounds = array<i64: 16, 768>}, {pipeline_mode = #tpu.pipeline_mode<synchronous>, transform_indices = @transform_4, window_bounds = array<i64: 1024, 256>}, {pipeline_mode = #tpu.pipeline_mode<synchronous>, transform_indices = @transform_5, window_bounds = array<i64: 1, 256>}, {transform_indices = @transform_6, window_bounds = array<i64: 128, 256>}]} {
    %c0 = arith.constant 0 : index
    %c0_0 = arith.constant 0 : index
    %0 = vector.load %arg1[%c0, %c0_0] : memref<128x1xi32, #tpu.memory_space<vmem>>, vector<128x1xi32>
    %1 = tpu.iota {dimensions = array<i32: 1>} : vector<128x6xi32>
    %2 = vector.broadcast %0 : vector<128x1xi32> to vector<128x6xi32>
    %3 = arith.cmpi eq, %2, %1 : vector<128x6xi32>
    %4 = arith.extui %3 : vector<128x6xi1> to vector<128x6xi32>
    %5 = arith.sitofp %4 : vector<128x6xi32> to vector<128x6xf32>
    %c0_1 = arith.constant 0 : index
    %c0_2 = arith.constant 0 : index
    %6 = vector.load %arg3[%c0_1, %c0_2] : memref<6x256xf32, #tpu.memory_space<vmem>>, vector<6x256xf32>
    %cst = arith.constant dense<0.000000e+00> : vector<128x256xf32>
    %7 = tpu.matmul %5, %6, %cst {dimension_numbers = #tpu.dot_dimension_numbers<[1], [0], [0], [1], [0, 0, 1, 1], [], []>} : vector<128x6xf32>, vector<6x256xf32>, vector<128x256xf32> -> vector<128x256xf32>
    %c0_3 = arith.constant 0 : index
    %c0_4 = arith.constant 0 : index
    %8 = vector.load %arg2[%c0_3, %c0_4] : memref<128x16xf32, #tpu.memory_space<vmem>>, vector<128x16xf32>
    %c0_5 = arith.constant 0 : index
    %c0_6 = arith.constant 0 : index
    %9 = vector.load %arg4[%c0_5, %c0_6] : memref<16x768xf32, #tpu.memory_space<vmem>>, vector<16x768xf32>
    %cst_7 = arith.constant dense<0.000000e+00> : vector<128x768xf32>
    %10 = tpu.matmul %8, %9, %cst_7 {dimension_numbers = #tpu.dot_dimension_numbers<[1], [0], [0], [1], [0, 0, 1, 1], [], []>} : vector<128x16xf32>, vector<16x768xf32>, vector<128x768xf32> -> vector<128x768xf32>
    %c0_8 = arith.constant 0 : index
    %c0_9 = arith.constant 0 : index
    %11 = vector.load %arg5[%c0_8, %c0_9] : memref<1024x256xf32, #tpu.memory_space<vmem>>, vector<256x256xf32>
    %cst_10 = arith.constant dense<0.000000e+00> : vector<128x256xf32>
    %12 = tpu.matmul %7, %11, %cst_10 {dimension_numbers = #tpu.dot_dimension_numbers<[1], [0], [0], [1], [0, 0, 1, 1], [], []>} : vector<128x256xf32>, vector<256x256xf32>, vector<128x256xf32> -> vector<128x256xf32>
    %c256 = arith.constant 256 : index
    %c0_11 = arith.constant 0 : index
    %13 = vector.load %arg5[%c256, %c0_11] : memref<1024x256xf32, #tpu.memory_space<vmem>>, vector<768x256xf32>
    %cst_12 = arith.constant dense<0.000000e+00> : vector<128x256xf32>
    %14 = tpu.matmul %10, %13, %cst_12 {dimension_numbers = #tpu.dot_dimension_numbers<[1], [0], [0], [1], [0, 0, 1, 1], [], []>} : vector<128x768xf32>, vector<768x256xf32>, vector<128x256xf32> -> vector<128x256xf32>
    %15 = arith.addf %12, %14 : vector<128x256xf32>
    %c0_13 = arith.constant 0 : index
    %c0_14 = arith.constant 0 : index
    %16 = vector.load %arg6[%c0_13, %c0_14] : memref<1x256xf32, #tpu.memory_space<vmem>>, vector<1x256xf32>
    %17 = vector.broadcast %16 : vector<1x256xf32> to vector<128x256xf32>
    %18 = arith.addf %15, %17 : vector<128x256xf32>
    %c0_15 = arith.constant 0 : index
    %c0_16 = arith.constant 0 : index
    %19 = vector.load %arg7[%c0_15, %c0_16] : memref<128x256xf32, #tpu.memory_space<vmem>>, vector<128x256xf32>
    tpu.vector_store %arg7[%c0_15, %c0_16], %18 {strides = array<i32>} : memref<128x256xf32, #tpu.memory_space<vmem>>, vector<128x256xf32>,
    return
  }
  func.func @transform_0(%arg0: i32) -> (i32, i32) {
    %c0_i32 = arith.constant 0 : i32
    %c0_i32_0 = arith.constant 0 : i32
    return %arg0, %c0_i32 : i32, i32
  }
  func.func @transform_1(%arg0: i32) -> (i32, i32) {
    %c0_i32 = arith.constant 0 : i32
    %c0_i32_0 = arith.constant 0 : i32
    return %arg0, %c0_i32 : i32, i32
  }
  func.func @transform_2(%arg0: i32) -> (i32, i32) {
    %c0_i32 = arith.constant 0 : i32
    %c0_i32_0 = arith.constant 0 : i32
    %c0_i32_1 = arith.constant 0 : i32
    return %c0_i32, %c0_i32_0 : i32, i32
  }
  func.func @transform_3(%arg0: i32) -> (i32, i32) {
    %c0_i32 = arith.constant 0 : i32
    %c0_i32_0 = arith.constant 0 : i32
    %c0_i32_1 = arith.constant 0 : i32
    return %c0_i32, %c0_i32_0 : i32, i32
  }
  func.func @transform_4(%arg0: i32) -> (i32, i32) {
    %c0_i32 = arith.constant 0 : i32
    %c0_i32_0 = arith.constant 0 : i32
    %c0_i32_1 = arith.constant 0 : i32
    return %c0_i32, %c0_i32_0 : i32, i32
  }
  func.func @transform_5(%arg0: i32) -> (i32, i32) {
    %c0_i32 = arith.constant 0 : i32
    %c0_i32_0 = arith.constant 0 : i32
    %c0_i32_1 = arith.constant 0 : i32
    return %c0_i32, %c0_i32_0 : i32, i32
  }
  func.func @transform_6(%arg0: i32) -> (i32, i32) {
    %c0_i32 = arith.constant 0 : i32
    %c0_i32_0 = arith.constant 0 : i32
    return %arg0, %c0_i32 : i32, i32
  }
}

</mosaic_0001>

<bundles_post_ra>
// kernel: tpu_custom_call.1
= control target key start
LH: loop header
LB: loop body
LE: loop exit
PB: predicated region body
PF: predicated region fallthrough
CT: control target
= control target key end

     0   :  { %11 = vsyncpa [#allocation3], 0  ;;  %s3672_s0 = inlined_call_operand.vmem [shape: s32[256,1], index: 0, kind: input, shape index: {}]   ;;  %s3673_s1 = inlined_call_operand.vmem [shape: f32[256,16], index: 1, kind: input, shape index: {}]   ;;  %s3674_s2 = inlined_call_operand.vmem [shape: f32[6,256], index: 2, kind: input, shape index: {}]   ;;  %s3675_s3 = inlined_call_operand.vmem [shape: f32[16,768], index: 3, kind: input, shape index: {}]   ;;  %s3676_s4 = inlined_call_operand.hbm [shape: f32[1024,256], index: 4, kind: input, shape index: {}]   ;;  %s3677_s5 = inlined_call_operand.vmem [shape: f32[1,256], index: 5, kind: input, shape index: {}]   ;;  %s3678_s6 = inlined_call_operand.hbm [shape: f32[256,256], index: 6, kind: output, shape index: {}]  }
   0x1   :  { %12 = vsyncpa [#allocation4], 0 }
   0x2   :  { %14 = vsyncpa [#allocation4 + $0x1], 0  ;;  %s2922_s21 = smov 0   ;;  %s2924_s22 = smov 0  }
   0x3   :  { %s2926_s23 = smov 0   ;;  %s2928_s24 = smov 0  }
   0x4 LB: > { %s2943_s25 = sadd.s32 4294967295, %s2877_s24   ;;  %s2260_s26 = sadd.s32 4294967294, %s2877_s24   ;;  %s2877_s24 = sphi %s2928_s24, %s3694_s24   ;;  %s2873_s23 = sphi %s2926_s23, %s3693_s23   ;;  %s2869_s22 = sphi %s2924_s22, %s3692_s22   ;;  %s2865_s21 = sphi %s2922_s21, %s3691_s21  }
   0x5   : > { %s2947_s27 = sadd.s32 1, %s2877_s24   ;;  %s163_s28 = sadd.s32 1, %s2873_s23 }
   0x6   : > { %s160_s29 = ssub.s32 %s2877_s24, %s2947_s27  ;;  %p173_p0 = scmp.ne.s32.totalorder %s2873_s23, %s2869_s22 }
   0x7   : > { %p161_p1 = scmp.eq.s32.totalorder %s160_s29, 0  ;;  %p174_p2 = scmp.eq.s32.totalorder %s2943_s25, 1 }
   0x8   : > { %p179_p3 = scmp.ne.s32.totalorder %s2869_s22, %s2865_s21  ;;  %p180_p4 = scmp.eq.s32.totalorder %s2260_s26, 1 }
   0x9   : > { %s2958_s30 = scalar_select %p161_p1, %s2873_s23, %s163_s28  }
   0xa   : > { %p2960_p5 = por %p174_p2, %p173_p0  ;;  %p2964_p6 = por %p180_p4, %p179_p3 }
   0xb   : > { %p2261_p7 = scmp.ge.s32.totalorder %s2877_s24, 1  ;;  %p187_p8 = scmp.lt.s32.totalorder %s2877_s24, 3 }
   0xc   : > { %s3682_s7 = scalar_select %p2960_p5, 1, 0 }
   0xd   : > { %s3683_s8 = scalar_select %p2964_p6, 1, 0 }
   0xe   : > { %p3679_p9 = scmp.eq.s32.totalorder %s2943_s25, 0  ;;  %p2971_p10 = pnand %p2261_p7, %p187_p8 }
   0xf   : > { %s2879_s10 = smov [#allocation2]   ;;  %s2783_s15 = scalar_lea.hbm %s3676_s4, 32768 }
  0x10   : > { %s3684_s9 = scalar_select %p2971_p10, 1, 0 }
  0x11   : > { %s205_s11 = sshll.u32 %s2879_s10, 4  ;;  %p2731_p11 = pneg %p2971_p10  ;;  %s206_s11 = int_to_ptr.vmem [resolvable:$true] %s205_s11 }
  0x12   : > { %p2784_p13 = scmp.ne.s32.totalorder %s3676_s4, %s2783_s15  ;;  %p2790_p3 = scmp.lt.u32.totalorder %s2783_s15, %s3676_s4 }
  0x13   : > { %p2979_p12 = pnand %p3679_p9, %p2731_p11 }
  0x15   : > { %p2785_p0 = pneg %p2979_p12 }
  0x17   : > { %p2786_p1 = pnand %p2785_p0, %p2784_p13 }
  0x19   : > { %p2787_p2 = pneg %p2786_p1 }
  0x1b   : > { %p2792_p4 = pnand %p2790_p3, %p2787_p2 }
  0x1d   : > { %2795 = shalt.err (!%p2792_p4)
}
  0x1e   : > { %s2796_s20 = scalar_lea.vmem %s206_s11, 32768  ;;  %p2804_p9 = scmp.lt.s32.totalorder %s206_s11, %s206_s11 }
  0x1f   : > { %p2797_p7 = scmp.ne.s32.totalorder %s206_s11, %s2796_s20  ;;  %p2805_p6 = scmp.lt.s32.totalorder %s2796_s20, %s2796_s20 }
  0x21   : > { %p2799_p8 = pnand %p2797_p7, %p2785_p0  ;;  %p2806_p5 = por %p2805_p6, %p2804_p9 }
  0x23   : > { %p2800_p11 = pneg %p2799_p8 }
  0x25   : > { %p2807_p10 = pnand %p2806_p5, %p2800_p11 }
  0x27   : > { %2810 = shalt.err (!%p2807_p10)
}
  0x28   : > { %s2880_s26 = smov 256   ;;  %s2881_s28 = smov 16  }
  0x29   : > { %2734 = dma.hbm_to_vmem [thread:$0]  (!%p2979_p12), %s3676_s4, 32768, %s206_s11, [#allocation3], %s2880_s26, %s2880_s26, %s2881_s28  }
  0x2a   : > { %p3686_p13 = scmp.ne.s32.totalorder %s3684_s9, 0 }
  0x2b   : > { %p3687_p1 = scmp.eq.s32.totalorder (!%p3686_p13), %s2943_s25, 0 }
  0x2c   : > { %242 = sbr.rel (%p3686_p13) target bundleno = 758 (0x2f6), region = 44 }
  0x33   : > { %2856 = dma.done.wait (%p3687_p1), [#allocation3], 32768   ;;  %p3688_p0 = pmov %p3687_p1 }
  0x34   : > { %s2267_s13 = sshll.u32 %s2943_s25, 4  ;;  %v2882_v0 = vmov 0.0   ;;  %v2883_v1 = vmov 0   ;;  %v640_v2 = vld [vmem:[%s3675_s3 + $0x8] sm:$0xff]  ;;  %v646_v3 = vld [vmem:[%s3675_s3 + $0x38] sm:$0xff]  ;;  %v639_v4 = vld [vmem:[%s3675_s3] sm:$0xff]  ;;  %v306_v60 = vlaneseq }
  0x35   : > { %2858 = vsyncadd (%p3688_p0), [#allocation3], 4294934528  ;;  %764 = vmatprep.mubr.f32.mxu1 %v2882_v0  ;;  %p278_p5 = scmp.lt.s32.totalorder %s2267_s13, 31  ;;  %2781 = vset.pattern.permute.xlu0 %v2883_v1  ;;  %v2361_v5 = vpack.c.bf16 %v646_v3, %v640_v2  ;;  %v645_v6 = vld [vmem:[%s3675_s3 + $0x30] sm:$0xff]  ;;  %v642_v7 = vld [vmem:[%s3675_s3 + $0x18] sm:$0xff]  ;;  %vm651_vm0 = vcmask 130048  }
  0x36   : > { %2782 = vset.pattern.permute.xlu1 %v2883_v1  ;;  %526 = vmatprep.mubr.f32.mxu0 %v2882_v0  ;;  %v2363_v8 = vpack.c.bf16 %v645_v6, %v639_v4  ;;  %v648_v9 = vld [vmem:[%s3675_s3 + $0x48] sm:$0xff]  ;;  %v641_v10 = vld [vmem:[%s3675_s3 + $0x10] sm:$0xff]  ;;  %v647_v11 = vld [vmem:[%s3675_s3 + $0x40] sm:$0xff]  ;;  %vm455_vm1 = vcmask 1045504   ;;  %v3220_v61 = vand.u32 127, %v306_v60  ;;  %vm406_vm2 = vcmask 48128  }
  0x37   : > { %s3696_s13 = smov (!%p278_p5, %s2267_s13), 31  ;;  %2362 = vmatprep.subr.bf16.mxu1 %v2361_v5  ;;  %v2365_v12 = vpack.c.bf16 %v648_v9, %v642_v7  ;;  %v2367_v15 = vpack.c.bf16 %v647_v11, %v641_v10  ;;  %v644_v23 = vld [vmem:[%s3675_s3 + $0x28] sm:$0xff]  ;;  %v650_v24 = vld [vmem:[%s3675_s3 + $0x58] sm:$0xff]  ;;  %v404_v29 = vld [vmem:[%s3674_s2] sm:$0x3f]  ;;  %s2360_s28 = sshll.u32 %s2943_s25, 12 }
  0x38   : > { %s2268_s9 = sshll.u32 %s3696_s13, 3  ;;  %2364 = vmatpush1.bf16.msra.mxu1 %v2363_v8  ;;  %v2369_v27 = vpack.c.bf16 %v650_v24, %v644_v23  ;;  %v405_v28 = vld [vmem:[%s3674_s2 + $0x8] sm:$0x3f]  ;;  %v643_v51 = vld [vmem:[%s3675_s3 + $0x20] sm:$0xff]  ;;  %v649_v52 = vld [vmem:[%s3675_s3 + $0x50] sm:$0xff]  ;;  %s3622_s12 = scalar_lea.hbm %s3678_s6, %s2360_s28 }
  0x39   : > { %s3020_s20 = scalar_lea.vmem %s3672_s0, %s2268_s9  ;;  %s3028_s13 = scalar_lea.vmem %s3673_s1, %s2268_s9  ;;  %2366 = vmatprep.subr.bf16.mxu1 %v2365_v12  ;;  %2287 = vmatprep.subr.msk.mxu0 %vm455_vm1, %v405_v28  ;;  %v1248_v53 = vld [vmem:[#allocation2 + $0x208] sm:$0xff]  ;;  %v1250_v54 = vld [vmem:[#allocation2 + $0x218] sm:$0xff]  ;;  %v2371_v55 = vpack.c.bf16 %v649_v52, %v643_v51  ;;  %v1247_v62 = vld [vmem:[#allocation2 + $0x200] sm:$0xff] }
  0x3a   : > { %v290_v13 = vld [vmem:[%s3020_s20] sm:$0xff]  ;;  %v292_v16 = vld [vmem:[%s3020_s20 + $0x10] sm:$0xff]  ;;  %v291_v17 = vld [vmem:[%s3020_s20 + $0x8] sm:$0xff]  ;;  %2288 = vmatpush1.msk.msra.mxu0 %vm455_vm1, %v404_v29  ;;  %v2373_v56 = vpack.c.bf16 %v1250_v54, %v1248_v53  ;;  %p3689_p9 = scmp.ne.s32.totalorder %s3682_s7, 0 }
  0x3b   : > { %v3044_v14 = vld [vmem:[%s3028_s13] sm:$0xff]  ;;  %309 = vperm.xlu0 %2781, %v290_v13   ;;  %315 = vperm.xlu1 %2782, %v292_v16   ;;  %v293_v18 = vld [vmem:[%s3020_s20 + $0x18] sm:$0xff]  ;;  %v3053_v19 = vld [vmem:[%s3028_s13 + $0x8] sm:$0xff] }
  0x3c   : > { %2305 = vmatmul.mubr.msk.f32.vlgmr.msra.gmra.mrb[0].mxu1 %vm651_vm0, %v3044_v14  ;;  %v294_v20 = vld [vmem:[%s3020_s20 + $0x20] sm:$0xff]  ;;  %v295_v21 = vld [vmem:[%s3020_s20 + $0x28] sm:$0xff]  ;;  %v3061_v22 = vld [vmem:[%s3028_s13 + $0x10] sm:$0xff] }
  0x3d   : > { %2368 = vmatpush1.bf16.msra.mxu1 %v2367_v15  ;;  %770 = vmatprep.mubr.f32.mxu1 %v2882_v0  ;;  %v296_v25 = vld [vmem:[%s3020_s20 + $0x30] sm:$0xff]  ;;  %v297_v26 = vld [vmem:[%s3020_s20 + $0x38] sm:$0xff]  ;;  %v298_v31 = vld [vmem:[%s3020_s20 + $0x40] sm:$0xff] }
  0x3e   : > { %v3082_v30 = vld [vmem:[%s3028_s13 + $0x18] sm:$0xff]  ;;  %2370 = vmatprep.subr.bf16.mxu1 %v2369_v27  ;;  %v299_v32 = vld [vmem:[%s3020_s20 + $0x48] sm:$0xff]  ;;  %v3091_v33 = vld [vmem:[%s3028_s13 + $0x20] sm:$0xff] }
  0x3f   : > { %312 = vperm.xlu0 %2781, %v291_v17   ;;  %318 = vperm.xlu1 %2782, %v293_v18   ;;  %v300_v34 = vld [vmem:[%s3020_s20 + $0x50] sm:$0xff]  ;;  %v301_v35 = vld [vmem:[%s3020_s20 + $0x58] sm:$0xff]  ;;  %v3099_v36 = vld [vmem:[%s3028_s13 + $0x28] sm:$0xff] }
  0x40   : > { %2306 = vmatmul.mubr.msk.f32.gmra.mrb[2].mxu1 %vm651_vm0, %v3053_v19  ;;  %v302_v37 = vld [vmem:[%s3020_s20 + $0x60] sm:$0xff]  ;;  %v303_v38 = vld [vmem:[%s3020_s20 + $0x68] sm:$0xff]  ;;  %v3107_v39 = vld [vmem:[%s3028_s13 + $0x30] sm:$0xff] }
  0x41   : > { %776 = vmatprep.mubr.f32.mxu1 %v2882_v0  ;;  %v304_v40 = vld [vmem:[%s3020_s20 + $0x70] sm:$0xff]  ;;  %v305_v41 = vld [vmem:[%s3020_s20 + $0x78] sm:$0xff]  ;;  %v3121_v43 = vld [vmem:[%s3028_s13 + $0x40] sm:$0xff]  ;;  %s2884_s20 = smov [#allocation5]  }
  0x42   : > { %v3115_v42 = vld [vmem:[%s3028_s13 + $0x38] sm:$0xff]  ;;  %v3127_v44 = vld [vmem:[%s3028_s13 + $0x48] sm:$0xff]  ;;  %v3133_v45 = vld [vmem:[%s3028_s13 + $0x50] sm:$0xff]  ;;  %s2815_s15 = sshll.u32 %s2884_s20, 4  ;;  %s2816_s15 = int_to_ptr.vmem [resolvable:$false] %s2815_s15 }
  0x43   : > { %321 = vperm.xlu0 %2781, %v294_v20   ;;  %324 = vperm.xlu1 %2782, %v295_v21   ;;  %v3139_v46 = vld [vmem:[%s3028_s13 + $0x58] sm:$0xff]  ;;  %v3145_v47 = vld [vmem:[%s3028_s13 + $0x60] sm:$0xff]  ;;  %v3151_v48 = vld [vmem:[%s3028_s13 + $0x68] sm:$0xff]  ;;  %s2817_s16 = scalar_lea.vmem %s2816_s15, 8192 }
  0x44   : > { %2307 = vmatmul.mubr.msk.f32.gmra.mrb[4].mxu1 %vm651_vm0, %v3061_v22  ;;  %v3157_v49 = vld [vmem:[%s3028_s13 + $0x70] sm:$0xff]  ;;  %v3163_v50 = vld [vmem:[%s3028_s13 + $0x78] sm:$0xff]  ;;  %v1312_v57 = vld [vmem:[#allocation2 + $0x408] sm:$0xff]  ;;  %s274_s13 = sand.u32 1, %s2869_s22  }
  0x45   : > { %782 = vmatprep.mubr.f32.mxu1 %v2882_v0  ;;  %v1314_v58 = vld [vmem:[#allocation2 + $0x418] sm:$0xff]  ;;  %v1249_v63 = vld [vmem:[#allocation2 + $0x210] sm:$0xff]  ;;  %v1252_v1 = vld [vmem:[#allocation2 + $0x228] sm:$0xff]  ;;  %s2266_s9 = sshll.u32 %s274_s13, 8  ;;  %s3631_s25 = scalar_lea.sflag [#allocation4], %s274_s13 }
  0x46   : > { %v2437_v59 = vpack.c.bf16 %v1314_v58, %v1312_v57  ;;  %v1254_v2 = vld [vmem:[#allocation2 + $0x238] sm:$0xff]  ;;  %v1311_v3 = vld [vmem:[#allocation2 + $0x400] sm:$0xff]  ;;  %v1313_v4 = vld [vmem:[#allocation2 + $0x410] sm:$0xff]  ;;  %v2375_v9 = vpack.c.bf16 %v1249_v63, %v1247_v62  ;;  %s3526_s26 = scalar_lea.vmem [#allocation5], %s2266_s9 }
  0x47   : > { %327 = vperm.xlu0 %2781, %v296_v25   ;;  %330 = vperm.xlu1 %2782, %v297_v26   ;;  %v1316_v6 = vld [vmem:[#allocation2 + $0x428] sm:$0xff]  ;;  %v1318_v7 = vld [vmem:[#allocation2 + $0x438] sm:$0xff]  ;;  %v2377_v11 = vpack.c.bf16 %v1254_v2, %v1252_v1  ;;  %v1251_v12 = vld [vmem:[#allocation2 + $0x220] sm:$0xff]  ;;  %v2439_v15 = vpack.c.bf16 %v1313_v4, %v1311_v3  ;;  %s2174_s29 = sshll.u32 %s3526_s26, 4  ;;  %s3624_s29 = int_to_ptr.vmem [resolvable:$true] %s2174_s29 }
  0x48   : > { %2308 = vmatmul.mubr.msk.f32.gmra.mrb[6].mxu1 %vm651_vm0, %v3082_v30  ;;  %2438 = vmatprep.subr.bf16.mxu0 %v2437_v59  ;;  %v1253_v13 = vld [vmem:[#allocation2 + $0x230] sm:$0xff]  ;;  %v1256_v16 = vld [vmem:[#allocation2 + $0x248] sm:$0xff]  ;;  %v2441_v17 = vpack.c.bf16 %v1318_v7, %v1316_v6  ;;  %v1315_v18 = vld [vmem:[#allocation2 + $0x420] sm:$0xff]  ;;  %s2811_s14 = scalar_lea.vmem %s3624_s29, 4096  ;;  %p2818_p2 = scmp.lt.s32.totalorder %s3624_s29, %s2816_s15 }
  0x49   : > { %788 = vmatprep.mubr.f32.mxu1 %v2882_v0  ;;  %v1317_v20 = vld [vmem:[#allocation2 + $0x430] sm:$0xff]  ;;  %v1258_v21 = vld [vmem:[#allocation2 + $0x258] sm:$0xff]  ;;  %v1320_v23 = vld [vmem:[#allocation2 + $0x448] sm:$0xff]  ;;  %v2379_v26 = vpack.c.bf16 %v1253_v13, %v1251_v12  ;;  %p2812_p6 = scmp.ne.s32.totalorder %s3624_s29, %s2811_s14  ;;  %p2819_p3 = scmp.lt.s32.totalorder %s2817_s16, %s2811_s14 }
  0x4a   : > { %v1322_v24 = vld [vmem:[#allocation2 + $0x458] sm:$0xff]  ;;  %v1255_v27 = vld [vmem:[#allocation2 + $0x240] sm:$0xff]  ;;  %v1257_v28 = vld [vmem:[#allocation2 + $0x250] sm:$0xff]  ;;  %v2443_v29 = vpack.c.bf16 %v1317_v20, %v1315_v18 }
  0x4b   : > { %333 = vperm.xlu0 %2781, %v298_v31   ;;  %336 = vperm.xlu1 %2782, %v299_v32   ;;  %v2381_v32 = vpack.c.bf16 %v1258_v21, %v1256_v16  ;;  %v1326_v51 = vld [vmem:[#allocation2 + $0x478] sm:$0xff]  ;;  %v2383_v53 = vpack.c.bf16 %v1257_v28, %v1255_v27  ;;  %v1259_v54 = vld [vmem:[#allocation2 + $0x260] sm:$0xff]  ;;  %v1264_v58 = vld [vmem:[#allocation2 + $0x288] sm:$0xff]  ;;  %p2813_p10 = pnand %p2812_p6, %p3689_p9  ;;  %p2820_p4 = por %p2819_p3, %p2818_p2 }
  0x4c   : > { %2309 = vmatmul.mubr.msk.f32.gmra.mrb[8].mxu1 %vm651_vm0, %v3091_v33  ;;  %v1323_v62 = vld [vmem:[#allocation2 + $0x460] sm:$0xff]  ;;  %v1325_v63 = vld [vmem:[#allocation2 + $0x470] sm:$0xff]  ;;  %v1266_v1 = vld [vmem:[#allocation2 + $0x298] sm:$0xff] }
  0x4d   : > { %794 = vmatprep.mubr.f32.mxu1 %v2882_v0  ;;  %v1328_v2 = vld [vmem:[#allocation2 + $0x488] sm:$0xff]  ;;  %v1330_v3 = vld [vmem:[#allocation2 + $0x498] sm:$0xff]  ;;  %v1263_v6 = vld [vmem:[#allocation2 + $0x280] sm:$0xff]  ;;  %p2814_p12 = pneg %p2813_p10 }
  0x4e   : > { %v1265_v7 = vld [vmem:[#allocation2 + $0x290] sm:$0xff]  ;;  %v1327_v12 = vld [vmem:[#allocation2 + $0x480] sm:$0xff]  ;;  %v1332_v16 = vld [vmem:[#allocation2 + $0x4a8] sm:$0xff] }
  0x4f   : > { %339 = vperm.xlu0 %2781, %v300_v34   ;;  %342 = vperm.xlu1 %2782, %v301_v35   ;;  %v1260_v34 = vld [vmem:[#allocation2 + $0x268] sm:$0xff]  ;;  %v2445_v35 = vpack.c.bf16 %v1322_v24, %v1320_v23  ;;  %v1329_v13 = vld [vmem:[#allocation2 + $0x490] sm:$0xff]  ;;  %v2391_v20 = vpack.c.bf16 %v1265_v7, %v1263_v6  ;;  %v1267_v21 = vld [vmem:[#allocation2 + $0x2a0] sm:$0xff]  ;;  %p2821_p7 = pnand %p2820_p4, %p2814_p12 }
  0x50   : > { %2310 = vmatmul.mubr.msk.f32.gmra.mrb[10].mxu1 %vm651_vm0, %v3099_v36  ;;  %v1269_v23 = vld [vmem:[#allocation2 + $0x2b0] sm:$0xff]  ;;  %v1331_v28 = vld [vmem:[#allocation2 + $0x4a0] sm:$0xff]  ;;  %v1282_v6 = vld [vmem:[#allocation2 + $0x318] sm:$0xff] }
  0x51   : > { %800 = vmatprep.mubr.f32.mxu1 %v2882_v0  ;;  %v1344_v7 = vld [vmem:[#allocation2 + $0x508] sm:$0xff] }
  0x53   : > { %345 = vperm.xlu0 %2781, %v302_v37   ;;  %348 = vperm.xlu1 %2782, %v303_v38   ;;  %v1319_v37 = vld [vmem:[#allocation2 + $0x440] sm:$0xff]  ;;  %v1321_v38 = vld [vmem:[#allocation2 + $0x450] sm:$0xff] }
  0x54   : > { %2311 = vmatmul.mubr.msk.f32.gmra.mrb[12].mxu1 %vm651_vm0, %v3107_v39 }
  0x55   : > { %806 = vmatprep.mubr.f32.mxu1 %v2882_v0 }
  0x57   : > { %351 = vperm.xlu0 %2781, %v304_v40   ;;  %354 = vperm.xlu1 %2782, %v305_v41   ;;  %v1262_v40 = vld [vmem:[#allocation2 + $0x278] sm:$0xff]  ;;  %v1324_v41 = vld [vmem:[#allocation2 + $0x468] sm:$0xff] }
  0x58   : > { %2312 = vmatmul.mubr.msk.f32.gmra.mrb[14].mxu1 %vm651_vm0, %v3115_v42  ;;  %v2385_v57 = vpack.c.bf16 %v1262_v40, %v1260_v34  ;;  %v2449_v59 = vpack.c.bf16 %v1326_v51, %v1324_v41  ;;  %v1276_v51 = vld [vmem:[#allocation2 + $0x2e8] sm:$0xff] }
  0x59   : > { %812 = vmatprep.mubr.f32.mxu1 %v2882_v0 }
  0x5c   : > { %2313 = vmatmul.mubr.msk.f32.gmra.mrb[16].mxu1 %vm651_vm0, %v3121_v43 }
  0x5d   : > { %818 = vmatprep.mubr.f32.mxu1 %v2882_v0 }
  0x60   : > { %2314 = vmatmul.mubr.msk.f32.gmra.mrb[18].mxu1 %vm651_vm0, %v3127_v44 }
  0x61   : > { %824 = vmatprep.mubr.f32.mxu1 %v2882_v0 }
  0x64   : > { %2315 = vmatmul.mubr.msk.f32.gmra.mrb[20].mxu1 %vm651_vm0, %v3133_v45 }
  0x65   : > { %830 = vmatprep.mubr.f32.mxu1 %v2882_v0 }
  0x68   : > { %2316 = vmatmul.mubr.msk.f32.gmra.mrb[22].mxu1 %vm651_vm0, %v3139_v46 }
  0x69   : > { %836 = vmatprep.mubr.f32.mxu1 %v2882_v0 }
  0x6c   : > { %2317 = vmatmul.mubr.msk.f32.gmra.mrb[24].mxu1 %vm651_vm0, %v3145_v47 }
  0x6d   : > { %842 = vmatprep.mubr.f32.mxu1 %v2882_v0 }
  0x70   : > { %2318 = vmatmul.mubr.msk.f32.gmra.mrb[26].mxu1 %vm651_vm0, %v3151_v48 }
  0x71   : > { %848 = vmatprep.mubr.f32.mxu1 %v2882_v0 }
  0x74   : > { %2319 = vmatmul.mubr.msk.f32.gmra.mrb[28].mxu1 %vm651_vm0, %v3157_v49 }
  0x75   : > { %854 = vmatprep.mubr.f32.mxu1 %v2882_v0 }
  0x78   : > { %2320 = vmatmul.mubr.msk.f32.gmra.mrb[30].mxu1 %vm651_vm0, %v3163_v50 }
  0x79   : > { %925 = vmatprep.mubr.f32.mxu1 %v2882_v0 }
  0x7c   : > { %2321 = vmatmul.mubr.msk.f32.vlgmr.msra.gmra.mrb[32].mxu1 %vm651_vm0, %v3044_v14 }
  0x7d   : > { %2372 = vmatpush1.bf16.msra.mxu1 %v2371_v55  ;;  %931 = vmatprep.mubr.f32.mxu1 %v2882_v0  ;;  %v1261_v55 = vld [vmem:[#allocation2 + $0x270] sm:$0xff] }
  0x7e   : > { %2374 = vmatprep.subr.bf16.mxu1 %v2373_v56 }
  0x80   : > { %2322 = vmatmul.mubr.msk.f32.gmra.mrb[34].mxu1 %vm651_vm0, %v3053_v19 }
  0x81   : > { %937 = vmatprep.mubr.f32.mxu1 %v2882_v0 }
  0x84   : > { %2323 = vmatmul.mubr.msk.f32.gmra.mrb[36].mxu1 %vm651_vm0, %v3061_v22 }
  0x85   : > { %943 = vmatprep.mubr.f32.mxu1 %v2882_v0 }
  0x88   : > { %2324 = vmatmul.mubr.msk.f32.gmra.mrb[38].mxu1 %vm651_vm0, %v3082_v30 }
  0x89   : > { %949 = vmatprep.mubr.f32.mxu1 %v2882_v0 }
  0x8c   : > { %2325 = vmatmul.mubr.msk.f32.gmra.mrb[40].mxu1 %vm651_vm0, %v3091_v33 }
  0x8d   : > { %955 = vmatprep.mubr.f32.mxu1 %v2882_v0 }
  0x90   : > { %2326 = vmatmul.mubr.msk.f32.gmra.mrb[42].mxu1 %vm651_vm0, %v3099_v36 }
  0x91   : > { %961 = vmatprep.mubr.f32.mxu1 %v2882_v0 }
  0x94   : > { %2327 = vmatmul.mubr.msk.f32.gmra.mrb[44].mxu1 %vm651_vm0, %v3107_v39 }
  0x95   : > { %967 = vmatprep.mubr.f32.mxu1 %v2882_v0 }
  0x98   : > { %2328 = vmatmul.mubr.msk.f32.gmra.mrb[46].mxu1 %vm651_vm0, %v3115_v42 }
  0x99   : > { %973 = vmatprep.mubr.f32.mxu1 %v2882_v0 }
  0x9c   : > { %2329 = vmatmul.mubr.msk.f32.gmra.mrb[48].mxu1 %vm651_vm0, %v3121_v43 }
  0x9d   : > { %979 = vmatprep.mubr.f32.mxu1 %v2882_v0 }
  0xa0   : > { %2330 = vmatmul.mubr.msk.f32.gmra.mrb[50].mxu1 %vm651_vm0, %v3127_v44 }
  0xa1   : > { %985 = vmatprep.mubr.f32.mxu1 %v2882_v0 }
  0xa4   : > { %2331 = vmatmul.mubr.msk.f32.gmra.mrb[52].mxu1 %vm651_vm0, %v3133_v45 }
  0xa5   : > { %991 = vmatprep.mubr.f32.mxu1 %v2882_v0 }
  0xa8   : > { %2332 = vmatmul.mubr.msk.f32.gmra.mrb[54].mxu1 %vm651_vm0, %v3139_v46 }
  0xa9   : > { %997 = vmatprep.mubr.f32.mxu1 %v2882_v0 }
  0xac   : > { %2333 = vmatmul.mubr.msk.f32.gmra.mrb[56].mxu1 %vm651_vm0, %v3145_v47 }
  0xad   : > { %1003 = vmatprep.mubr.f32.mxu1 %v2882_v0 }
  0xb0   : > { %2334 = vmatmul.mubr.msk.f32.gmra.mrb[58].mxu1 %vm651_vm0, %v3151_v48 }
  0xb1   : > { %1009 = vmatprep.mubr.f32.mxu1 %v2882_v0 }
  0xb4   : > { %2335 = vmatmul.mubr.msk.f32.gmra.mrb[60].mxu1 %vm651_vm0, %v3157_v49 }
  0xb5   : > { %1015 = vmatprep.mubr.f32.mxu1 %v2882_v0 }
  0xb8   : > { %2336 = vmatmul.mubr.msk.f32.gmra.mrb[62].mxu1 %vm651_vm0, %v3163_v50 }
  0xb9   : > { %1086 = vmatprep.mubr.f32.mxu1 %v2882_v0 }
  0xba   : > { %v310_v5 = vpop.permute.xlu0 %309  ;;  %v316_v8 = vpop.permute.xlu1 %315 }
  0xbb   : > { %vm356_vm3 = vcmp.eq.s32.totalorder %v310_v5, %v3220_v61  ;;  %vm358_vm5 = vcmp.eq.s32.totalorder %v316_v8, %v3220_v61  ;;  %v2387_v5 = vpack.c.bf16 %v1261_v55, %v1259_v54  ;;  %v1337_v54 = vld [vmem:[#allocation2 + $0x4d0] sm:$0xff]  ;;  %v1278_v55 = vld [vmem:[#allocation2 + $0x2f8] sm:$0xff] }
  0xbc   : > { %v2271_v10 = vsel %vm356_vm3, 1.0, %v2882_v0  ;;  %2337 = vmatmul.mubr.msk.f32.vlgmr.msra.gmra.mrb[64].mxu1 %vm651_vm0, %v3044_v14  ;;  %v2273_v52 = vsel %vm358_vm5, 1.0, %v2882_v0 }
  0xbd   : > { %2289 = vmatmul.mubr.msk.f32.vlgmr.msra.gmra.mrb[0].mxu0 %vm406_vm2, %v2271_v10  ;;  %1092 = vmatprep.mubr.f32.mxu1 %v2882_v0  ;;  %v1268_v10 = vld [vmem:[#allocation2 + $0x2a8] sm:$0xff] }
  0xbe   : > { %532 = vmatprep.mubr.f32.mxu0 %v2882_v0  ;;  %v313_v25 = vpop.permute.xlu0 %312  ;;  %2376 = vmatpush1.bf16.msra.mxu1 %v2375_v9  ;;  %v319_v31 = vpop.permute.xlu1 %318  ;;  %v2389_v9 = vpack.c.bf16 %v1266_v1, %v1264_v58  ;;  %v2401_v1 = vpack.c.bf16 %v1278_v55, %v1276_v51  ;;  %v1351_v55 = vld [vmem:[#allocation2 + $0x540] sm:$0xff] }
  0xbf   : > { %vm357_vm4 = vcmp.eq.s32.totalorder %v313_v25, %v3220_v61  ;;  %2378 = vmatprep.subr.bf16.mxu1 %v2377_v11  ;;  %2440 = vmatpush1.bf16.msra.mxu0 %v2439_v15  ;;  %vm359_vm6 = vcmp.eq.s32.totalorder %v319_v31, %v3220_v61  ;;  %v2453_v11 = vpack.c.bf16 %v1330_v3, %v1328_v2  ;;  %v1270_v15 = vld [vmem:[#allocation2 + $0x2b8] sm:$0xff]  ;;  %v1336_v31 = vld [vmem:[#allocation2 + $0x4c8] sm:$0xff] }
  0xc0   : > { %v2272_v14 = vsel %vm357_vm4, 1.0, %v2882_v0  ;;  %2442 = vmatprep.subr.bf16.mxu0 %v2441_v17  ;;  %2338 = vmatmul.mubr.msk.f32.gmra.mrb[66].mxu1 %vm651_vm0, %v3053_v19  ;;  %v2447_v19 = vpack.c.bf16 %v1321_v38, %v1319_v37  ;;  %v2274_v4 = vsel %vm359_vm6, 1.0, %v2882_v0  ;;  %v1334_v17 = vld [vmem:[#allocation2 + $0x4b8] sm:$0xff]  ;;  %v2393_v25 = vpack.c.bf16 %v1270_v15, %v1268_v10  ;;  %v1271_v37 = vld [vmem:[#allocation2 + $0x2c0] sm:$0xff]  ;;  %v1273_v38 = vld [vmem:[#allocation2 + $0x2d0] sm:$0xff] }
  0xc1   : > { %2290 = vmatmul.mubr.msk.f32.gmra.mrb[2].mxu0 %vm406_vm2, %v2272_v14  ;;  %1098 = vmatprep.mubr.f32.mxu1 %v2882_v0  ;;  %v2457_v27 = vpack.c.bf16 %v1334_v17, %v1332_v16  ;;  %v1274_v14 = vld [vmem:[#allocation2 + $0x2d8] sm:$0xff]  ;;  %v2399_v58 = vpack.c.bf16 %v1273_v38, %v1271_v37  ;;  %v1280_v2 = vld [vmem:[#allocation2 + $0x308] sm:$0xff]  ;;  %v1279_v10 = vld [vmem:[#allocation2 + $0x300] sm:$0xff] }
  0xc2   : > { %538 = vmatprep.mubr.f32.mxu0 %v2882_v0  ;;  %2380 = vmatpush1.bf16.msra.mxu1 %v2379_v26  ;;  %v322_v56 = vpop.permute.xlu0 %321  ;;  %v325_v8 = vpop.permute.xlu1 %324  ;;  %v1272_v26 = vld [vmem:[#allocation2 + $0x2c8] sm:$0xff]  ;;  %v1343_v17 = vld [vmem:[#allocation2 + $0x500] sm:$0xff]  ;;  %v1354_v37 = vld [vmem:[#allocation2 + $0x558] sm:$0xff] }
  0xc3   : > { %2444 = vmatpush1.bf16.msra.mxu0 %v2443_v29  ;;  %2382 = vmatprep.subr.bf16.mxu1 %v2381_v32  ;;  %vm360_vm7 = vcmp.eq.s32.totalorder %v322_v56, %v3220_v61  ;;  %vm361_vm8 = vcmp.eq.s32.totalorder %v325_v8, %v3220_v61  ;;  %v1333_v29 = vld [vmem:[#allocation2 + $0x4b0] sm:$0xff]  ;;  %v1338_v32 = vld [vmem:[#allocation2 + $0x4d8] sm:$0xff]  ;;  %v2397_v41 = vpack.c.bf16 %v1274_v14, %v1272_v26  ;;  %v1284_v15 = vld [vmem:[#allocation2 + $0x328] sm:$0xff] }
  0xc4   : > { %2446 = vmatprep.subr.bf16.mxu0 %v2445_v35  ;;  %2339 = vmatmul.mubr.msk.f32.gmra.mrb[68].mxu1 %vm651_vm0, %v3061_v22  ;;  %v2451_v22 = vpack.c.bf16 %v1325_v63, %v1323_v62  ;;  %v2275_v18 = vsel %vm360_vm7, 1.0, %v2882_v0  ;;  %v2276_v34 = vsel %vm361_vm8, 1.0, %v2882_v0  ;;  %v2395_v35 = vpack.c.bf16 %v1269_v23, %v1267_v21  ;;  %v1342_v56 = vld [vmem:[#allocation2 + $0x4f8] sm:$0xff]  ;;  %v1277_v62 = vld [vmem:[#allocation2 + $0x2f0] sm:$0xff]  ;;  %v1348_v21 = vld [vmem:[#allocation2 + $0x528] sm:$0xff] }
  0xc5   : > { %2291 = vmatmul.mubr.msk.f32.gmra.mrb[4].mxu0 %vm406_vm2, %v2273_v52  ;;  %1104 = vmatprep.mubr.f32.mxu1 %v2882_v0  ;;  %v2461_v52 = vpack.c.bf16 %v1338_v32, %v1336_v31  ;;  %v1350_v23 = vld [vmem:[#allocation2 + $0x538] sm:$0xff]  ;;  %v1285_v26 = vld [vmem:[#allocation2 + $0x330] sm:$0xff]  ;;  %v1347_v31 = vld [vmem:[#allocation2 + $0x520] sm:$0xff] }
  0xc6   : > { %544 = vmatprep.mubr.f32.mxu0 %v2882_v0  ;;  %2384 = vmatpush1.bf16.msra.mxu1 %v2383_v53  ;;  %v328_v24 = vpop.permute.xlu0 %327  ;;  %v331_v40 = vpop.permute.xlu1 %330  ;;  %v1335_v53 = vld [vmem:[#allocation2 + $0x4c0] sm:$0xff]  ;;  %v2473_v14 = vpack.c.bf16 %v1350_v23, %v1348_v21  ;;  %v1349_v32 = vld [vmem:[#allocation2 + $0x530] sm:$0xff]  ;;  %v1364_v21 = vld [vmem:[#allocation2 + $0x5a8] sm:$0xff] }
  0xc7   : > { %2448 = vmatpush1.bf16.msra.mxu0 %v2447_v19  ;;  %2386 = vmatprep.subr.bf16.mxu1 %v2385_v57  ;;  %vm362_vm9 = vcmp.eq.s32.totalorder %v328_v24, %v3220_v61  ;;  %v1340_v19 = vld [vmem:[#allocation2 + $0x4e8] sm:$0xff]  ;;  %vm363_vm10 = vcmp.eq.s32.totalorder %v331_v40, %v3220_v61  ;;  %v1287_v40 = vld [vmem:[#allocation2 + $0x340] sm:$0xff]  ;;  %v1366_v23 = vld [vmem:[#allocation2 + $0x5b8] sm:$0xff] }
  0xc8   : > { %2450 = vmatprep.subr.bf16.mxu0 %v2449_v59  ;;  %2340 = vmatmul.mubr.msk.f32.gmra.mrb[70].mxu1 %vm651_vm0, %v3082_v30  ;;  %v2455_v30 = vpack.c.bf16 %v1329_v13, %v1327_v12  ;;  %v2277_v57 = vsel %vm362_vm9, 1.0, %v2882_v0  ;;  %v1275_v59 = vld [vmem:[#allocation2 + $0x2e0] sm:$0xff]  ;;  %v2465_v3 = vpack.c.bf16 %v1342_v56, %v1340_v19  ;;  %v2278_v8 = vsel %vm363_vm10, 1.0, %v2882_v0  ;;  %v1353_v19 = vld [vmem:[#allocation2 + $0x550] sm:$0xff]  ;;  %v1294_v56 = vld [vmem:[#allocation2 + $0x378] sm:$0xff] }
  0xc9   : > { %2292 = vmatmul.mubr.msk.f32.gmra.mrb[6].mxu0 %vm406_vm2, %v2274_v4  ;;  %1110 = vmatprep.mubr.f32.mxu1 %v2882_v0  ;;  %v1339_v4 = vld [vmem:[#allocation2 + $0x4e0] sm:$0xff]  ;;  %v2405_v13 = vpack.c.bf16 %v1282_v6, %v1280_v2  ;;  %v1357_v6 = vld [vmem:[#allocation2 + $0x570] sm:$0xff] }
  0xca   : > { %550 = vmatprep.mubr.f32.mxu0 %v2882_v0  ;;  %2388 = vmatpush1.bf16.msra.mxu1 %v2387_v5  ;;  %v334_v63 = vpop.permute.xlu0 %333  ;;  %v1341_v5 = vld [vmem:[#allocation2 + $0x4f0] sm:$0xff]  ;;  %v337_v12 = vpop.permute.xlu1 %336 }
  0xcb   : > { %2452 = vmatpush1.bf16.msra.mxu0 %v2451_v22  ;;  %2390 = vmatprep.subr.bf16.mxu1 %v2389_v9  ;;  %v1346_v22 = vld [vmem:[#allocation2 + $0x518] sm:$0xff]  ;;  %vm364_vm11 = vcmp.eq.s32.totalorder %v334_v63, %v3220_v61  ;;  %v2403_v9 = vpack.c.bf16 %v1277_v62, %v1275_v59  ;;  %vm365_vm12 = vcmp.eq.s32.totalorder %v337_v12, %v3220_v61  ;;  %v1293_v63 = vld [vmem:[#allocation2 + $0x370] sm:$0xff] }
  0xcc   : > { %2454 = vmatprep.subr.bf16.mxu0 %v2453_v11  ;;  %2341 = vmatmul.mubr.msk.f32.gmra.mrb[72].mxu1 %vm651_vm0, %v3091_v33  ;;  %v2459_v33 = vpack.c.bf16 %v1333_v29, %v1331_v28  ;;  %v1281_v11 = vld [vmem:[#allocation2 + $0x310] sm:$0xff]  ;;  %v2469_v16 = vpack.c.bf16 %v1346_v22, %v1344_v7  ;;  %v1288_v29 = vld [vmem:[#allocation2 + $0x348] sm:$0xff]  ;;  %v2280_v38 = vsel %vm365_vm12, 1.0, %v2882_v0  ;;  %v1298_v7 = vld [vmem:[#allocation2 + $0x398] sm:$0xff] }
  0xcd   : > { %2293 = vmatmul.mubr.msk.f32.gmra.mrb[8].mxu0 %vm406_vm2, %v2275_v18  ;;  %1116 = vmatprep.mubr.f32.mxu1 %v2882_v0  ;;  %v1345_v18 = vld [vmem:[#allocation2 + $0x510] sm:$0xff]  ;;  %v2407_v24 = vpack.c.bf16 %v1281_v11, %v1279_v10  ;;  %v1360_v22 = vld [vmem:[#allocation2 + $0x588] sm:$0xff]  ;;  %v1295_v11 = vld [vmem:[#allocation2 + $0x380] sm:$0xff] }
  0xce   : > { %556 = vmatprep.mubr.f32.mxu0 %v2882_v0  ;;  %2392 = vmatpush1.bf16.msra.mxu1 %v2391_v20  ;;  %v1286_v20 = vld [vmem:[#allocation2 + $0x338] sm:$0xff]  ;;  %v343_v51 = vpop.permute.xlu1 %342 }
  0xcf   : > { %2456 = vmatpush1.bf16.msra.mxu0 %v2455_v30  ;;  %2394 = vmatprep.subr.bf16.mxu1 %v2393_v25  ;;  %v2279_v30 = vsel %vm364_vm11, 1.0, %v2882_v0  ;;  %v1283_v25 = vld [vmem:[#allocation2 + $0x320] sm:$0xff]  ;;  %v2409_v28 = vpack.c.bf16 %v1286_v20, %v1284_v15  ;;  %vm367_vm14 = vcmp.eq.s32.totalorder %v343_v51, %v3220_v61  ;;  %v1300_v15 = vld [vmem:[#allocation2 + $0x3a8] sm:$0xff]  ;;  %v1302_v20 = vld [vmem:[#allocation2 + $0x3b8] sm:$0xff] }
  0xd0   : > { %2458 = vmatprep.subr.bf16.mxu0 %v2457_v27  ;;  %2342 = vmatmul.mubr.msk.f32.gmra.mrb[74].mxu1 %vm651_vm0, %v3099_v36  ;;  %v2463_v36 = vpack.c.bf16 %v1337_v54, %v1335_v53  ;;  %v340_v27 = vpop.permute.xlu0 %339  ;;  %v1292_v53 = vld [vmem:[#allocation2 + $0x368] sm:$0xff] }
  0xd1   : > { %2294 = vmatmul.mubr.msk.f32.gmra.mrb[10].mxu0 %vm406_vm2, %v2276_v34  ;;  %1122 = vmatprep.mubr.f32.mxu1 %v2882_v0  ;;  %v1290_v34 = vld [vmem:[#allocation2 + $0x358] sm:$0xff]  ;;  %vm366_vm13 = vcmp.eq.s32.totalorder %v340_v27, %v3220_v61  ;;  %v2417_v2 = vpack.c.bf16 %v1294_v56, %v1292_v53  ;;  %v2425_v27 = vpack.c.bf16 %v1302_v20, %v1300_v15  ;;  %v1308_v51 = vld [vmem:[#allocation2 + $0x3e8] sm:$0xff]  ;;  %v1367_v53 = vld [vmem:[#allocation2 + $0x5c0] sm:$0xff] }
  0xd2   : > { %562 = vmatprep.mubr.f32.mxu0 %v2882_v0  ;;  %2396 = vmatpush1.bf16.msra.mxu1 %v2395_v35  ;;  %v1352_v35 = vld [vmem:[#allocation2 + $0x548] sm:$0xff]  ;;  %v2281_v59 = vsel %vm366_vm13, 1.0, %v2882_v0  ;;  %v349_v12 = vpop.permute.xlu1 %348  ;;  %v1374_v56 = vld [vmem:[#allocation2 + $0x5f8] sm:$0xff] }
  0xd3   : > { %2460 = vmatpush1.bf16.msra.mxu0 %v2459_v33  ;;  %2398 = vmatprep.subr.bf16.mxu1 %v2397_v41  ;;  %v2411_v33 = vpack.c.bf16 %v1285_v26, %v1283_v25  ;;  %v1289_v41 = vld [vmem:[#allocation2 + $0x350] sm:$0xff]  ;;  %v2477_v54 = vpack.c.bf16 %v1354_v37, %v1352_v35  ;;  %vm369_vm1 = vcmp.eq.s32.totalorder %v349_v12, %v3220_v61  ;;  %v1299_v25 = vld [vmem:[#allocation2 + $0x3a0] sm:$0xff]  ;;  %v1370_v35 = vld [vmem:[#allocation2 + $0x5d8] sm:$0xff] }
  0xd4   : > { %2462 = vmatprep.subr.bf16.mxu0 %v2461_v52  ;;  %2343 = vmatmul.mubr.msk.f32.gmra.mrb[76].mxu1 %vm651_vm0, %v3107_v39  ;;  %v2467_v39 = vpack.c.bf16 %v1341_v5, %v1339_v4  ;;  %v2413_v52 = vpack.c.bf16 %v1290_v34, %v1288_v29  ;;  %v2415_v62 = vpack.c.bf16 %v1289_v41, %v1287_v40  ;;  %v1355_v5 = vld [vmem:[#allocation2 + $0x560] sm:$0xff]  ;;  %v1301_v26 = vld [vmem:[#allocation2 + $0x3b0] sm:$0xff]  ;;  %v1368_v34 = vld [vmem:[#allocation2 + $0x5c8] sm:$0xff]  ;;  %v2284_v37 = vsel %vm369_vm1, 1.0, %v2882_v0 }
  0xd5   : > { %2295 = vmatmul.mubr.msk.f32.gmra.mrb[12].mxu0 %vm406_vm2, %v2277_v57  ;;  %1128 = vmatprep.mubr.f32.mxu1 %v2882_v0  ;;  %v1356_v57 = vld [vmem:[#allocation2 + $0x568] sm:$0xff]  ;;  %v2489_v29 = vpack.c.bf16 %v1366_v23, %v1364_v21  ;;  %v1305_v40 = vld [vmem:[#allocation2 + $0x3d0] sm:$0xff] }
  0xd6   : > { %568 = vmatprep.mubr.f32.mxu0 %v2882_v0  ;;  %2400 = vmatpush1.bf16.msra.mxu1 %v2399_v58  ;;  %v1358_v58 = vld [vmem:[#allocation2 + $0x578] sm:$0xff]  ;;  %v355_v41 = vpop.permute.xlu1 %354 }
  0xd7   : > { %2464 = vmatpush1.bf16.msra.mxu0 %v2463_v36  ;;  %2402 = vmatprep.subr.bf16.mxu1 %v2401_v1  ;;  %v1291_v36 = vld [vmem:[#allocation2 + $0x360] sm:$0xff]  ;;  %v346_v1 = vpop.permute.xlu0 %345  ;;  %v2481_v4 = vpack.c.bf16 %v1358_v58, %v1356_v57  ;;  %vm371_vm4 = vcmp.eq.s32.totalorder %v355_v41, %v3220_v61 }
  0xd8   : > { %2466 = vmatprep.subr.bf16.mxu0 %v2465_v3  ;;  %2344 = vmatmul.mubr.msk.f32.gmra.mrb[78].mxu1 %vm651_vm0, %v3115_v42  ;;  %v2471_v42 = vpack.c.bf16 %v1345_v18, %v1343_v17  ;;  %v1296_v3 = vld [vmem:[#allocation2 + $0x388] sm:$0xff]  ;;  %vm368_vm15 = vcmp.eq.s32.totalorder %v346_v1, %v3220_v61  ;;  %v2419_v10 = vpack.c.bf16 %v1293_v63, %v1291_v36  ;;  %v1359_v17 = vld [vmem:[#allocation2 + $0x580] sm:$0xff]  ;;  %v1361_v18 = vld [vmem:[#allocation2 + $0x590] sm:$0xff] }
  0xd9   : > { %2296 = vmatmul.mubr.msk.f32.gmra.mrb[14].mxu0 %vm406_vm2, %v2278_v8  ;;  %1134 = vmatprep.mubr.f32.mxu1 %v2882_v0  ;;  %v1362_v8 = vld [vmem:[#allocation2 + $0x598] sm:$0xff]  ;;  %v1309_v36 = vld [vmem:[#allocation2 + $0x3f0] sm:$0xff] }
  0xda   : > { %574 = vmatprep.mubr.f32.mxu0 %v2882_v0  ;;  %2404 = vmatpush1.bf16.msra.mxu1 %v2403_v9  ;;  %v2282_v9 = vsel %vm367_vm14, 1.0, %v2882_v0  ;;  %v1373_v1 = vld [vmem:[#allocation2 + $0x5f0] sm:$0xff] }
  0xdb   : > { %2468 = vmatpush1.bf16.msra.mxu0 %v2467_v39  ;;  %2406 = vmatprep.subr.bf16.mxu1 %v2405_v13  ;;  %v1297_v39 = vld [vmem:[#allocation2 + $0x390] sm:$0xff]  ;;  %v2421_v13 = vpack.c.bf16 %v1298_v7, %v1296_v3  ;;  %v1378_v3 = vld [vmem:[#allocation2 + $0x618] sm:$0xff] }
  0xdc   : > { %2470 = vmatprep.subr.bf16.mxu0 %v2469_v16  ;;  %2345 = vmatmul.mubr.msk.f32.gmra.mrb[80].mxu1 %vm651_vm0, %v3121_v43  ;;  %v2475_v43 = vpack.c.bf16 %v1349_v32, %v1347_v31  ;;  %v2485_v16 = vpack.c.bf16 %v1362_v8, %v1360_v22  ;;  %v1365_v31 = vld [vmem:[#allocation2 + $0x5b0] sm:$0xff]  ;;  %v1306_v32 = vld [vmem:[#allocation2 + $0x3d8] sm:$0xff] }
  0xdd   : > { %2297 = vmatmul.mubr.msk.f32.gmra.mrb[16].mxu0 %vm406_vm2, %v2279_v30  ;;  %1140 = vmatprep.mubr.f32.mxu1 %v2882_v0  ;;  %v2283_v30 = vsel %vm368_vm15, 1.0, %v2882_v0 }
  0xde   : > { %580 = vmatprep.mubr.f32.mxu0 %v2882_v0  ;;  %2408 = vmatpush1.bf16.msra.mxu1 %v2407_v24  ;;  %v2423_v24 = vpack.c.bf16 %v1297_v39, %v1295_v11 }
  0xdf   : > { %2472 = vmatpush1.bf16.msra.mxu0 %v2471_v42  ;;  %2410 = vmatprep.subr.bf16.mxu1 %v2409_v28  ;;  %v352_v42 = vpop.permute.xlu0 %351  ;;  %v1304_v28 = vld [vmem:[#allocation2 + $0x3c8] sm:$0xff] }
  0xe0   : > { %2474 = vmatprep.subr.bf16.mxu0 %v2473_v14  ;;  %2346 = vmatmul.mubr.msk.f32.gmra.mrb[82].mxu1 %vm651_vm0, %v3127_v44  ;;  %v2479_v44 = vpack.c.bf16 %v1353_v19, %v1351_v55  ;;  %v1363_v14 = vld [vmem:[#allocation2 + $0x5a0] sm:$0xff]  ;;  %vm370_vm3 = vcmp.eq.s32.totalorder %v352_v42, %v3220_v61  ;;  %v1310_v55 = vld [vmem:[#allocation2 + $0x3f8] sm:$0xff]  ;;  %v1372_v19 = vld [vmem:[#allocation2 + $0x5e8] sm:$0xff] }
  0xe1   : > { %2298 = vmatmul.mubr.msk.f32.gmra.mrb[18].mxu0 %vm406_vm2, %v2280_v38  ;;  %1146 = vmatprep.mubr.f32.mxu1 %v2882_v0  ;;  %v2427_v38 = vpack.c.bf16 %v1301_v26, %v1299_v25  ;;  %v2285_v57 = vsel %vm370_vm3, 1.0, %v2882_v0  ;;  %v2497_v63 = vpack.c.bf16 %v1374_v56, %v1372_v19 }
  0xe2   : > { %586 = vmatprep.mubr.f32.mxu0 %v2882_v0  ;;  %2412 = vmatpush1.bf16.msra.mxu1 %v2411_v33  ;;  %v1303_v33 = vld [vmem:[#allocation2 + $0x3c0] sm:$0xff] }
  0xe3   : > { %2476 = vmatpush1.bf16.msra.mxu0 %v2475_v43  ;;  %2414 = vmatprep.subr.bf16.mxu1 %v2413_v52  ;;  %v2429_v43 = vpack.c.bf16 %v1306_v32, %v1304_v28  ;;  %v2493_v52 = vpack.c.bf16 %v1370_v35, %v1368_v34  ;;  %v2431_v58 = vpack.c.bf16 %v1305_v40, %v1303_v33  ;;  %v1375_v34 = vld [vmem:[#allocation2 + $0x600] sm:$0xff]  ;;  %v1377_v35 = vld [vmem:[#allocation2 + $0x610] sm:$0xff] }
  0xe4   : > { %2478 = vmatprep.subr.bf16.mxu0 %v2477_v54  ;;  %2347 = vmatmul.mubr.msk.f32.gmra.mrb[84].mxu1 %vm651_vm0, %v3133_v45  ;;  %v2483_v45 = vpack.c.bf16 %v1357_v6, %v1355_v5  ;;  %v1369_v54 = vld [vmem:[#allocation2 + $0x5d0] sm:$0xff]  ;;  %v2503_v40 = vpack.c.bf16 %v1377_v35, %v1375_v34  ;;  %v1407_v35 = vld [vmem:[#allocation2 + $0x700] sm:$0xff] }
  0xe5   : > { %2299 = vmatmul.mubr.msk.f32.gmra.mrb[20].mxu0 %vm406_vm2, %v2281_v59  ;;  %1152 = vmatprep.mubr.f32.mxu1 %v2882_v0  ;;  %v1307_v59 = vld [vmem:[#allocation2 + $0x3e0] sm:$0xff] }
  0xe6   : > { %592 = vmatprep.mubr.f32.mxu0 %v2882_v0  ;;  %2416 = vmatpush1.bf16.msra.mxu1 %v2415_v62  ;;  %v2433_v62 = vpack.c.bf16 %v1310_v55, %v1308_v51  ;;  %v2435_v5 = vpack.c.bf16 %v1309_v36, %v1307_v59  ;;  %v1381_v51 = vld [vmem:[#allocation2 + $0x630] sm:$0xff]  ;;  %v1388_v59 = vld [vmem:[#allocation2 + $0x668] sm:$0xff] }
  0xe7   : > { %2480 = vmatpush1.bf16.msra.mxu0 %v2479_v44  ;;  %2418 = vmatprep.subr.bf16.mxu1 %v2417_v2  ;;  %v1371_v44 = vld [vmem:[#allocation2 + $0x5e0] sm:$0xff]  ;;  %v1376_v2 = vld [vmem:[#allocation2 + $0x608] sm:$0xff] }
  0xe8   : > { %2482 = vmatprep.subr.bf16.mxu0 %v2481_v4  ;;  %2348 = vmatmul.mubr.msk.f32.gmra.mrb[86].mxu1 %vm651_vm0, %v3139_v46  ;;  %v2487_v46 = vpack.c.bf16 %v1361_v18, %v1359_v17  ;;  %v2286_v4 = vsel %vm371_vm4, 1.0, %v2882_v0  ;;  %v2499_v6 = vpack.c.bf16 %v1373_v1, %v1371_v44  ;;  %v2501_v7 = vpack.c.bf16 %v1378_v3, %v1376_v2  ;;  %v1387_v1 = vld [vmem:[#allocation2 + $0x660] sm:$0xff]  ;;  %v1389_v2 = vld [vmem:[#allocation2 + $0x670] sm:$0xff]  ;;  %v1392_v3 = vld [vmem:[#allocation2 + $0x688] sm:$0xff] }
  0xe9   : > { %2300 = vmatmul.mubr.msk.f32.gmra.mrb[22].mxu0 %vm406_vm2, %v2282_v9  ;;  %1158 = vmatprep.mubr.f32.mxu1 %v2882_v0 }
  0xea   : > { %598 = vmatprep.mubr.f32.mxu0 %v2882_v0  ;;  %2420 = vmatpush1.bf16.msra.mxu1 %v2419_v10 }
  0xeb   : > { %2484 = vmatpush1.bf16.msra.mxu0 %v2483_v45  ;;  %2422 = vmatprep.subr.bf16.mxu1 %v2421_v13 }
  0xec   : > { %2486 = vmatprep.subr.bf16.mxu0 %v2485_v16  ;;  %2349 = vmatmul.mubr.msk.f32.gmra.mrb[88].mxu1 %vm651_vm0, %v3145_v47  ;;  %v2491_v47 = vpack.c.bf16 %v1365_v31, %v1363_v14 }
  0xed   : > { %2301 = vmatmul.mubr.msk.f32.gmra.mrb[24].mxu0 %vm406_vm2, %v2283_v30  ;;  %1164 = vmatprep.mubr.f32.mxu1 %v2882_v0 }
  0xee   : > { %604 = vmatprep.mubr.f32.mxu0 %v2882_v0  ;;  %2424 = vmatpush1.bf16.msra.mxu1 %v2423_v24 }
  0xef   : > { %2488 = vmatpush1.bf16.msra.mxu0 %v2487_v46  ;;  %2426 = vmatprep.subr.bf16.mxu1 %v2425_v27 }
  0xf0   : > { %2490 = vmatprep.subr.bf16.mxu0 %v2489_v29  ;;  %2350 = vmatmul.mubr.msk.f32.gmra.mrb[90].mxu1 %vm651_vm0, %v3151_v48  ;;  %v2495_v48 = vpack.c.bf16 %v1369_v54, %v1367_v53  ;;  %v1386_v53 = vld [vmem:[#allocation2 + $0x658] sm:$0xff] }
  0xf1   : > { %2302 = vmatmul.mubr.msk.f32.gmra.mrb[26].mxu0 %vm406_vm2, %v2284_v37  ;;  %1170 = vmatprep.mubr.f32.mxu1 %v2882_v0  ;;  %v1380_v37 = vld [vmem:[#allocation2 + $0x628] sm:$0xff] }
  0xf2   : > { %610 = vmatprep.mubr.f32.mxu0 %v2882_v0  ;;  %2428 = vmatpush1.bf16.msra.mxu1 %v2427_v38  ;;  %v1382_v38 = vld [vmem:[#allocation2 + $0x638] sm:$0xff] }
  0xf3   : > { %2492 = vmatpush1.bf16.msra.mxu0 %v2491_v47  ;;  %2430 = vmatprep.subr.bf16.mxu1 %v2429_v43  ;;  %v2505_v41 = vpack.c.bf16 %v1382_v38, %v1380_v37  ;;  %v1379_v43 = vld [vmem:[#allocation2 + $0x620] sm:$0xff]  ;;  %v1409_v37 = vld [vmem:[#allocation2 + $0x710] sm:$0xff]  ;;  %v1412_v38 = vld [vmem:[#allocation2 + $0x728] sm:$0xff] }
  0xf4   : > { %2494 = vmatprep.subr.bf16.mxu0 %v2493_v52  ;;  %2351 = vmatmul.mubr.msk.f32.gmra.mrb[92].mxu1 %vm651_vm0, %v3157_v49  ;;  %v1384_v52 = vld [vmem:[#allocation2 + $0x648] sm:$0xff]  ;;  %v2507_v55 = vpack.c.bf16 %v1381_v51, %v1379_v43  ;;  %v1411_v51 = vld [vmem:[#allocation2 + $0x720] sm:$0xff] }
  0xf5   : > { %2303 = vmatmul.mubr.msk.f32.gmra.mrb[28].mxu0 %vm406_vm2, %v2285_v57  ;;  %1176 = vmatprep.mubr.f32.mxu1 %v2882_v0  ;;  %v2509_v56 = vpack.c.bf16 %v1386_v53, %v1384_v52  ;;  %v1383_v57 = vld [vmem:[#allocation2 + $0x640] sm:$0xff]  ;;  %v1413_v52 = vld [vmem:[#allocation2 + $0x730] sm:$0xff]  ;;  %v1416_v53 = vld [vmem:[#allocation2 + $0x748] sm:$0xff] }
  0xf6   : > { %616 = vmatprep.mubr.f32.mxu0 %v2882_v0  ;;  %2432 = vmatpush1.bf16.msra.mxu1 %v2431_v58  ;;  %v1385_v58 = vld [vmem:[#allocation2 + $0x650] sm:$0xff] }
  0xf7   : > { %2496 = vmatpush1.bf16.msra.mxu0 %v2495_v48  ;;  %2434 = vmatprep.subr.bf16.mxu1 %v2433_v62  ;;  %v1390_v48 = vld [vmem:[#allocation2 + $0x678] sm:$0xff]  ;;  %v2511_v36 = vpack.c.bf16 %v1385_v58, %v1383_v57  ;;  %v1415_v58 = vld [vmem:[#allocation2 + $0x740] sm:$0xff] }
  0xf8   : > { %2498 = vmatprep.subr.bf16.mxu0 %v2497_v63  ;;  %2352 = vmatmul.mubr.msk.f32.gmra.mrb[94].mxu1 %vm651_vm0, %v3163_v50  ;;  %v2513_v44 = vpack.c.bf16 %v1390_v48, %v1388_v59  ;;  %v1417_v59 = vld [vmem:[#allocation2 + $0x750] sm:$0xff]  ;;  %v1420_v48 = vld [vmem:[#allocation2 + $0x768] sm:$0xff] }
  0xf9   : > { %2304 = vmatmul.mubr.msk.f32.gmra.mrb[30].mxu0 %vm406_vm2, %v2286_v4  ;;  %v1394_v4 = vld [vmem:[#allocation2 + $0x698] sm:$0xff] }
  0xfa   : > { %2436 = vmatpush1.bf16.msra.mxu1 %v2435_v5 }
  0xfb   : > { %2500 = vmatpush1.bf16.msra.mxu0 %v2499_v6  ;;  %v2515_v6 = vpack.c.bf16 %v1389_v2, %v1387_v1  ;;  %v1419_v2 = vld [vmem:[#allocation2 + $0x760] sm:$0xff] }
  0xfc   : > { %2502 = vmatprep.subr.bf16.mxu0 %v2501_v7 }
 0x10f   : > { %v766_v49 = vpop.f32.mrb[0].mxu1 }
 0x110   : > { %v768_v61 = vpop.f32.mrb[1].mxu1 }
 0x111   : > { %1503 = vmatprep.mubr.f32.mxu1 %v768_v61  ;;  %v1391_v61 = vld [vmem:[#allocation2 + $0x680] sm:$0xff] }
 0x112   : > { %1504 = vmatmul.mubr.f32.vlgmr.msra.gmra.mrb[96].mxu1 %v766_v49  ;;  %v2517_v49 = vpack.c.bf16 %v1394_v4, %v1392_v3  ;;  %v1421_v3 = vld [vmem:[#allocation2 + $0x770] sm:$0xff]  ;;  %v1424_v4 = vld [vmem:[#allocation2 + $0x788] sm:$0xff] }
 0x113   : > { %v772_v0 = vpop.f32.mrb[2].mxu1 }
 0x114   : > { %v774_v22 = vpop.f32.mrb[3].mxu1 }
 0x115   : > { %1509 = vmatprep.mubr.f32.mxu1 %v774_v22  ;;  %v1396_v22 = vld [vmem:[#allocation2 + $0x6a8] sm:$0xff] }
 0x116   : > { %1510 = vmatmul.mubr.f32.gmra.mrb[98].mxu1 %v772_v0  ;;  %v1393_v0 = vld [vmem:[#allocation2 + $0x690] sm:$0xff] }
 0x117   : > { %v778_v8 = vpop.f32.mrb[4].mxu1 }
 0x118   : > { %v780_v9 = vpop.f32.mrb[5].mxu1 }
 0x119   : > { %1515 = vmatprep.mubr.f32.mxu1 %v780_v9 }
 0x11a   : > { %1516 = vmatmul.mubr.f32.gmra.mrb[100].mxu1 %v778_v8  ;;  %v1398_v8 = vld [vmem:[#allocation2 + $0x6b8] sm:$0xff] }
 0x11b   : > { %v784_v10 = vpop.f32.mrb[6].mxu1 }
 0x11c   : > { %v786_v11 = vpop.f32.mrb[7].mxu1 }
 0x11d   : > { %1521 = vmatprep.mubr.f32.mxu1 %v786_v11 }
 0x11e   : > { %1522 = vmatmul.mubr.f32.gmra.mrb[102].mxu1 %v784_v10  ;;  %v2519_v10 = vpack.c.bf16 %v1393_v0, %v1391_v61  ;;  %v1423_v0 = vld [vmem:[#allocation2 + $0x780] sm:$0xff] }
 0x11f   : > { %v790_v50 = vpop.f32.mrb[8].mxu1 }
 0x120   : > { %v792_v39 = vpop.f32.mrb[9].mxu1 }
 0x121   : > { %1527 = vmatprep.mubr.f32.mxu1 %v792_v39  ;;  %v1395_v39 = vld [vmem:[#allocation2 + $0x6a0] sm:$0xff] }
 0x122   : > { %1528 = vmatmul.mubr.f32.gmra.mrb[104].mxu1 %v790_v50  ;;  %v2521_v50 = vpack.c.bf16 %v1398_v8, %v1396_v22  ;;  %v1425_v22 = vld [vmem:[#allocation2 + $0x790] sm:$0xff]  ;;  %v1428_v8 = vld [vmem:[#allocation2 + $0x7a8] sm:$0xff] }
 0x123   : > { %v796_v45 = vpop.f32.mrb[10].mxu1 }
 0x124   : > { %v798_v12 = vpop.f32.mrb[11].mxu1 }
 0x125   : > { %1533 = vmatprep.mubr.f32.mxu1 %v798_v12  ;;  %v1400_v12 = vld [vmem:[#allocation2 + $0x6c8] sm:$0xff] }
 0x126   : > { %1534 = vmatmul.mubr.f32.gmra.mrb[106].mxu1 %v796_v45  ;;  %v1397_v45 = vld [vmem:[#allocation2 + $0x6b0] sm:$0xff] }
 0x127   : > { %v802_v13 = vpop.f32.mrb[12].mxu1 }
 0x128   : > { %v804_v15 = vpop.f32.mrb[13].mxu1 }
 0x129   : > { %1539 = vmatprep.mubr.f32.mxu1 %v804_v15 }
 0x12a   : > { %1540 = vmatmul.mubr.f32.gmra.mrb[108].mxu1 %v802_v13  ;;  %v1402_v13 = vld [vmem:[#allocation2 + $0x6d8] sm:$0xff] }
 0x12b   : > { %v808_v16 = vpop.f32.mrb[14].mxu1 }
 0x12c   : > { %v810_v17 = vpop.f32.mrb[15].mxu1 }
 0x12d   : > { %1545 = vmatprep.mubr.f32.mxu1 %v810_v17 }
 0x12e   : > { %1546 = vmatmul.mubr.f32.gmra.mrb[110].mxu1 %v808_v16  ;;  %v2523_v16 = vpack.c.bf16 %v1397_v45, %v1395_v39  ;;  %v1427_v45 = vld [vmem:[#allocation2 + $0x7a0] sm:$0xff] }
 0x12f   : > { %v814_v18 = vpop.f32.mrb[16].mxu1 }
 0x130   : > { %v816_v20 = vpop.f32.mrb[17].mxu1 }
 0x131   : > { %1551 = vmatprep.mubr.f32.mxu1 %v816_v20  ;;  %v1399_v20 = vld [vmem:[#allocation2 + $0x6c0] sm:$0xff] }
 0x132   : > { %1552 = vmatmul.mubr.f32.gmra.mrb[112].mxu1 %v814_v18  ;;  %v2525_v18 = vpack.c.bf16 %v1402_v13, %v1400_v12  ;;  %v1429_v12 = vld [vmem:[#allocation2 + $0x7b0] sm:$0xff]  ;;  %v1432_v13 = vld [vmem:[#allocation2 + $0x7c8] sm:$0xff] }
 0x133   : > { %v820_v21 = vpop.f32.mrb[18].mxu1 }
 0x134   : > { %v822_v23 = vpop.f32.mrb[19].mxu1 }
 0x135   : > { %1557 = vmatprep.mubr.f32.mxu1 %v822_v23  ;;  %v1404_v23 = vld [vmem:[#allocation2 + $0x6e8] sm:$0xff] }
 0x136   : > { %1558 = vmatmul.mubr.f32.gmra.mrb[114].mxu1 %v820_v21  ;;  %v1401_v21 = vld [vmem:[#allocation2 + $0x6d0] sm:$0xff] }
 0x137   : > { %v826_v30 = vpop.f32.mrb[20].mxu1 }
 0x138   : > { %v828_v24 = vpop.f32.mrb[21].mxu1 }
 0x139   : > { %1563 = vmatprep.mubr.f32.mxu1 %v828_v24 }
 0x13a   : > { %1564 = vmatmul.mubr.f32.gmra.mrb[116].mxu1 %v826_v30  ;;  %v1406_v30 = vld [vmem:[#allocation2 + $0x6f8] sm:$0xff] }
 0x13b   : > { %v832_v25 = vpop.f32.mrb[22].mxu1 }
 0x13c   : > { %v834_v26 = vpop.f32.mrb[23].mxu1 }
 0x13d   : > { %1569 = vmatprep.mubr.f32.mxu1 %v834_v26 }
 0x13e   : > { %1570 = vmatmul.mubr.f32.gmra.mrb[118].mxu1 %v832_v25  ;;  %v2527_v25 = vpack.c.bf16 %v1401_v21, %v1399_v20  ;;  %v1431_v21 = vld [vmem:[#allocation2 + $0x7c0] sm:$0xff] }
 0x13f   : > { %v838_v46 = vpop.f32.mrb[24].mxu1 }
 0x140   : > { %v840_v42 = vpop.f32.mrb[25].mxu1 }
 0x141   : > { %1575 = vmatprep.mubr.f32.mxu1 %v840_v42  ;;  %v1403_v42 = vld [vmem:[#allocation2 + $0x6e0] sm:$0xff] }
 0x142   : > { %1576 = vmatmul.mubr.f32.gmra.mrb[120].mxu1 %v838_v46  ;;  %v2529_v46 = vpack.c.bf16 %v1406_v30, %v1404_v23  ;;  %v1433_v23 = vld [vmem:[#allocation2 + $0x7d0] sm:$0xff]  ;;  %v1436_v30 = vld [vmem:[#allocation2 + $0x7e8] sm:$0xff] }
 0x143   : > { %v844_v27 = vpop.f32.mrb[26].mxu1 }
 0x144   : > { %v846_v28 = vpop.f32.mrb[27].mxu1 }
 0x145   : > { %1581 = vmatprep.mubr.f32.mxu1 %v846_v28  ;;  %v1408_v28 = vld [vmem:[#allocation2 + $0x708] sm:$0xff] }
 0x146   : > { %1582 = vmatmul.mubr.f32.gmra.mrb[122].mxu1 %v844_v27  ;;  %v1405_v27 = vld [vmem:[#allocation2 + $0x6f0] sm:$0xff] }
 0x147   : > { %v850_v29 = vpop.f32.mrb[28].mxu1 }
 0x148   : > { %v852_v14 = vpop.f32.mrb[29].mxu1 }
 0x149   : > { %1587 = vmatprep.mubr.f32.mxu1 %v852_v14 }
 0x14a   : > { %1588 = vmatmul.mubr.f32.gmra.mrb[124].mxu1 %v850_v29  ;;  %v1410_v29 = vld [vmem:[#allocation2 + $0x718] sm:$0xff] }
 0x14b   : > { %v856_v31 = vpop.f32.mrb[30].mxu1  ;;  %v2533_v34 = vpack.c.bf16 %v1410_v29, %v1408_v28  ;;  %v1437_v28 = vld [vmem:[#allocation2 + $0x7f0] sm:$0xff]  ;;  %v1184_v29 = vld [vmem:[#allocation2 + $0x8] sm:$0xff] }
 0x14c   : > { %v858_v32 = vpop.f32.mrb[31].mxu1 }
 0x14d   : > { %1593 = vmatprep.mubr.f32.mxu1 %v858_v32 }
 0x14e   : > { %1594 = vmatmul.mubr.f32.gmra.mrb[126].mxu1 %v856_v31  ;;  %v2531_v31 = vpack.c.bf16 %v1405_v27, %v1403_v42  ;;  %v1435_v27 = vld [vmem:[#allocation2 + $0x7e0] sm:$0xff] }
 0x14f   : > { %v927_v33 = vpop.f32.mrb[32].mxu1 }
 0x150   : > { %v929_v47 = vpop.f32.mrb[33].mxu1 }
 0x151   : > { %1664 = vmatprep.mubr.f32.mxu0 %v929_v47  ;;  %v2535_v47 = vpack.c.bf16 %v1409_v37, %v1407_v35  ;;  %v1183_v37 = vld [vmem:[#allocation2] sm:$0xff] }
 0x152   : > { %1665 = vmatmul.mubr.f32.vlgmr.msra.gmra.mrb[32].mxu0 %v927_v33  ;;  %v1414_v33 = vld [vmem:[#allocation2 + $0x738] sm:$0xff] }
 0x153   : > { %v933_v54 = vpop.f32.mrb[34].mxu1  ;;  %2504 = vmatpush1.bf16.msra.mxu0 %v2503_v40  ;;  %v2537_v43 = vpack.c.bf16 %v1414_v33, %v1412_v38  ;;  %v1185_v38 = vld [vmem:[#allocation2 + $0x10] sm:$0xff]  ;;  %v1188_v33 = vld [vmem:[#allocation2 + $0x28] sm:$0xff] }
 0x154   : > { %v935_v19 = vpop.f32.mrb[35].mxu1  ;;  %2506 = vmatprep.subr.bf16.mxu0 %v2505_v41 }
 0x155   : > { %1670 = vmatprep.mubr.f32.mxu0 %v935_v19  ;;  %v2539_v19 = vpack.c.bf16 %v1413_v52, %v1411_v51 }
 0x156   : > { %1671 = vmatmul.mubr.f32.gmra.mrb[34].mxu0 %v933_v54  ;;  %v1418_v54 = vld [vmem:[#allocation2 + $0x758] sm:$0xff] }
 0x157   : > { %v939_v62 = vpop.f32.mrb[36].mxu1  ;;  %2508 = vmatpush1.bf16.msra.mxu0 %v2507_v55  ;;  %v2541_v57 = vpack.c.bf16 %v1418_v54, %v1416_v53  ;;  %v1187_v54 = vld [vmem:[#allocation2 + $0x20] sm:$0xff] }
 0x158   : > { %v941_v63 = vpop.f32.mrb[37].mxu1  ;;  %2510 = vmatprep.subr.bf16.mxu0 %v2509_v56 }
 0x159   : > { %1676 = vmatprep.mubr.f32.mxu0 %v941_v63  ;;  %v2543_v63 = vpack.c.bf16 %v1417_v59, %v1415_v58 }
 0x15a   : > { %1677 = vmatmul.mubr.f32.gmra.mrb[36].mxu0 %v939_v62  ;;  %v1422_v62 = vld [vmem:[#allocation2 + $0x778] sm:$0xff] }
 0x15b   : > { %v945_v5 = vpop.f32.mrb[38].mxu1  ;;  %2512 = vmatpush1.bf16.msra.mxu0 %v2511_v36  ;;  %v2545_v1 = vpack.c.bf16 %v1422_v62, %v1420_v48 }
 0x15c   : > { %v947_v7 = vpop.f32.mrb[39].mxu1  ;;  %2514 = vmatprep.subr.bf16.mxu0 %v2513_v44 }
 0x15d   : > { %1682 = vmatprep.mubr.f32.mxu0 %v947_v7  ;;  %v2547_v7 = vpack.c.bf16 %v1421_v3, %v1419_v2  ;;  %v1198_v2 = vld [vmem:[#allocation2 + $0x78] sm:$0xff] }
 0x15e   : > { %1683 = vmatmul.mubr.f32.gmra.mrb[38].mxu0 %v945_v5  ;;  %v1426_v5 = vld [vmem:[#allocation2 + $0x798] sm:$0xff] }
 0x15f   : > { %v951_v9 = vpop.f32.mrb[40].mxu1  ;;  %2516 = vmatpush1.bf16.msra.mxu0 %v2515_v6  ;;  %v2549_v61 = vpack.c.bf16 %v1426_v5, %v1424_v4 }
 0x160   : > { %v953_v11 = vpop.f32.mrb[41].mxu1  ;;  %2518 = vmatprep.subr.bf16.mxu0 %v2517_v49 }
 0x161   : > { %1688 = vmatprep.mubr.f32.mxu0 %v953_v11  ;;  %v2551_v11 = vpack.c.bf16 %v1425_v22, %v1423_v0  ;;  %v1200_v22 = vld [vmem:[#allocation2 + $0x88] sm:$0xff] }
 0x162   : > { %1689 = vmatmul.mubr.f32.gmra.mrb[40].mxu0 %v951_v9  ;;  %v1430_v9 = vld [vmem:[#allocation2 + $0x7b8] sm:$0xff] }
 0x163   : > { %v957_v15 = vpop.f32.mrb[42].mxu1  ;;  %2520 = vmatpush1.bf16.msra.mxu0 %v2519_v10  ;;  %v2553_v39 = vpack.c.bf16 %v1430_v9, %v1428_v8  ;;  %v1202_v8 = vld [vmem:[#allocation2 + $0x98] sm:$0xff] }
 0x164   : > { %v959_v17 = vpop.f32.mrb[43].mxu1  ;;  %2522 = vmatprep.subr.bf16.mxu0 %v2521_v50 }
 0x165   : > { %1694 = vmatprep.mubr.f32.mxu0 %v959_v17  ;;  %v2555_v17 = vpack.c.bf16 %v1429_v12, %v1427_v45  ;;  %v1199_v45 = vld [vmem:[#allocation2 + $0x80] sm:$0xff]  ;;  %v1201_v12 = vld [vmem:[#allocation2 + $0x90] sm:$0xff] }
 0x166   : > { %1695 = vmatmul.mubr.f32.gmra.mrb[42].mxu0 %v957_v15  ;;  %v1434_v15 = vld [vmem:[#allocation2 + $0x7d8] sm:$0xff] }
 0x167   : > { %v963_v24 = vpop.f32.mrb[44].mxu1  ;;  %2524 = vmatpush1.bf16.msra.mxu0 %v2523_v16  ;;  %v2557_v20 = vpack.c.bf16 %v1434_v15, %v1432_v13  ;;  %v1204_v15 = vld [vmem:[#allocation2 + $0xa8] sm:$0xff] }
 0x168   : > { %v965_v26 = vpop.f32.mrb[45].mxu1  ;;  %2526 = vmatprep.subr.bf16.mxu0 %v2525_v18 }
 0x169   : > { %1700 = vmatprep.mubr.f32.mxu0 %v965_v26  ;;  %v2559_v26 = vpack.c.bf16 %v1433_v23, %v1431_v21 }
 0x16a   : > { %1701 = vmatmul.mubr.f32.gmra.mrb[44].mxu0 %v963_v24  ;;  %v1438_v24 = vld [vmem:[#allocation2 + $0x7f8] sm:$0xff] }
 0x16b   : > { %v969_v14 = vpop.f32.mrb[46].mxu1  ;;  %2528 = vmatpush1.bf16.msra.mxu0 %v2527_v25  ;;  %v2561_v42 = vpack.c.bf16 %v1438_v24, %v1436_v30  ;;  %v1203_v30 = vld [vmem:[#allocation2 + $0xa0] sm:$0xff]  ;;  %v1205_v24 = vld [vmem:[#allocation2 + $0xb0] sm:$0xff] }
 0x16c   : > { %v971_v32 = vpop.f32.mrb[47].mxu1  ;;  %2530 = vmatprep.subr.bf16.mxu0 %v2529_v46 }
 0x16d   : > { %1706 = vmatprep.mubr.f32.mxu0 %v971_v32  ;;  %v2563_v32 = vpack.c.bf16 %v1437_v28, %v1435_v27  ;;  %v2587_v27 = vpack.c.bf16 %v1205_v24, %v1203_v30  ;;  %v1230_v30 = vld [vmem:[#allocation2 + $0x178] sm:$0xff] }
 0x16e   : > { %1707 = vmatmul.mubr.f32.gmra.mrb[46].mxu0 %v969_v14  ;;  %v1186_v14 = vld [vmem:[#allocation2 + $0x18] sm:$0xff] }
 0x16f   : > { %v975_v40 = vpop.f32.mrb[48].mxu1  ;;  %2532 = vmatpush1.bf16.msra.mxu0 %v2531_v31  ;;  %v2565_v35 = vpack.c.bf16 %v1186_v14, %v1184_v29 }
 0x170   : > { %v977_v41 = vpop.f32.mrb[49].mxu1  ;;  %2534 = vmatprep.subr.bf16.mxu0 %v2533_v34 }
 0x171   : > { %1712 = vmatprep.mubr.f32.mxu0 %v977_v41 }
 0x172   : > { %1713 = vmatmul.mubr.f32.gmra.mrb[48].mxu0 %v975_v40  ;;  %v1190_v40 = vld [vmem:[#allocation2 + $0x38] sm:$0xff] }
 0x173   : > { %v981_v55 = vpop.f32.mrb[50].mxu1  ;;  %2536 = vmatpush1.bf16.msra.mxu0 %v2535_v47  ;;  %v2569_v53 = vpack.c.bf16 %v1190_v40, %v1188_v33 }
 0x174   : > { %v983_v56 = vpop.f32.mrb[51].mxu1  ;;  %2538 = vmatprep.subr.bf16.mxu0 %v2537_v43  ;;  %v2567_v43 = vpack.c.bf16 %v1185_v38, %v1183_v37  ;;  %v1214_v37 = vld [vmem:[#allocation2 + $0xf8] sm:$0xff] }
 0x175   : > { %1718 = vmatprep.mubr.f32.mxu0 %v983_v56  ;;  %v1194_v56 = vld [vmem:[#allocation2 + $0x58] sm:$0xff] }
 0x176   : > { %1719 = vmatmul.mubr.f32.gmra.mrb[50].mxu0 %v981_v55  ;;  %v1189_v55 = vld [vmem:[#allocation2 + $0x30] sm:$0xff] }
 0x177   : > { %v987_v36 = vpop.f32.mrb[52].mxu1  ;;  %2540 = vmatpush1.bf16.msra.mxu0 %v2539_v19  ;;  %v1192_v19 = vld [vmem:[#allocation2 + $0x48] sm:$0xff]  ;;  %v2571_v58 = vpack.c.bf16 %v1189_v55, %v1187_v54 }
 0x178   : > { %v989_v44 = vpop.f32.mrb[53].mxu1  ;;  %2542 = vmatprep.subr.bf16.mxu0 %v2541_v57  ;;  %v2573_v62 = vpack.c.bf16 %v1194_v56, %v1192_v19  ;;  %v1216_v55 = vld [vmem:[#allocation2 + $0x108] sm:$0xff]  ;;  %v1218_v19 = vld [vmem:[#allocation2 + $0x118] sm:$0xff] }
 0x179   : > { %1724 = vmatprep.mubr.f32.mxu0 %v989_v44 }
 0x17a   : > { %1725 = vmatmul.mubr.f32.gmra.mrb[52].mxu0 %v987_v36  ;;  %v1191_v36 = vld [vmem:[#allocation2 + $0x40] sm:$0xff] }
 0x17b   : > { %v993_v6 = vpop.f32.mrb[54].mxu1  ;;  %2544 = vmatpush1.bf16.msra.mxu0 %v2543_v63  ;;  %v1193_v63 = vld [vmem:[#allocation2 + $0x50] sm:$0xff] }
 0x17c   : > { %v995_v49 = vpop.f32.mrb[55].mxu1  ;;  %2546 = vmatprep.subr.bf16.mxu0 %v2545_v1  ;;  %v1196_v1 = vld [vmem:[#allocation2 + $0x68] sm:$0xff]  ;;  %v2575_v4 = vpack.c.bf16 %v1193_v63, %v1191_v36  ;;  %v1215_v36 = vld [vmem:[#allocation2 + $0x100] sm:$0xff]  ;;  %v1217_v63 = vld [vmem:[#allocation2 + $0x110] sm:$0xff] }
 0x17d   : > { %1730 = vmatprep.mubr.f32.mxu0 %v995_v49  ;;  %v1195_v49 = vld [vmem:[#allocation2 + $0x60] sm:$0xff] }
 0x17e   : > { %1731 = vmatmul.mubr.f32.gmra.mrb[54].mxu0 %v993_v6 }
 0x17f   : > { %v999_v10 = vpop.f32.mrb[56].mxu1  ;;  %2548 = vmatpush1.bf16.msra.mxu0 %v2547_v7  ;;  %v2577_v7 = vpack.c.bf16 %v1198_v2, %v1196_v1  ;;  %v1220_v2 = vld [vmem:[#allocation2 + $0x128] sm:$0xff] }
 0x180   : > { %v1001_v50 = vpop.f32.mrb[57].mxu1  ;;  %2550 = vmatprep.subr.bf16.mxu0 %v2549_v61  ;;  %v1197_v61 = vld [vmem:[#allocation2 + $0x70] sm:$0xff] }
 0x181   : > { %1736 = vmatprep.mubr.f32.mxu0 %v1001_v50 }
 0x182   : > { %1737 = vmatmul.mubr.f32.gmra.mrb[56].mxu0 %v999_v10  ;;  %v2579_v10 = vpack.c.bf16 %v1197_v61, %v1195_v49 }
 0x183   : > { %v1005_v16 = vpop.f32.mrb[58].mxu1  ;;  %2552 = vmatpush1.bf16.msra.mxu0 %v2551_v11 }
 0x184   : > { %v1007_v18 = vpop.f32.mrb[59].mxu1  ;;  %2554 = vmatprep.subr.bf16.mxu0 %v2553_v39  ;;  %v2581_v39 = vpack.c.bf16 %v1202_v8, %v1200_v22  ;;  %v1219_v22 = vld [vmem:[#allocation2 + $0x120] sm:$0xff]  ;;  %v1221_v8 = vld [vmem:[#allocation2 + $0x130] sm:$0xff] }
 0x185   : > { %1742 = vmatprep.mubr.f32.mxu0 %v1007_v18  ;;  %v2583_v18 = vpack.c.bf16 %v1201_v12, %v1199_v45  ;;  %v2603_v45 = vpack.c.bf16 %v1221_v8, %v1219_v22 }
 0x186   : > { %1743 = vmatmul.mubr.f32.gmra.mrb[58].mxu0 %v1005_v16  ;;  %v1206_v16 = vld [vmem:[#allocation2 + $0xb8] sm:$0xff] }
 0x187   : > { %v1011_v25 = vpop.f32.mrb[60].mxu1  ;;  %2556 = vmatpush1.bf16.msra.mxu0 %v2555_v17  ;;  %v2585_v23 = vpack.c.bf16 %v1206_v16, %v1204_v15 }
 0x188   : > { %v1013_v46 = vpop.f32.mrb[61].mxu1  ;;  %2558 = vmatprep.subr.bf16.mxu0 %v2557_v20 }
 0x189   : > { %1748 = vmatprep.mubr.f32.mxu0 %v1013_v46  ;;  %v1210_v46 = vld [vmem:[#allocation2 + $0xd8] sm:$0xff] }
 0x18a   : > { %1749 = vmatmul.mubr.f32.gmra.mrb[60].mxu0 %v1011_v25 }
 0x18b   : > { %v1017_v31 = vpop.f32.mrb[62].mxu1  ;;  %2560 = vmatpush1.bf16.msra.mxu0 %v2559_v26  ;;  %v1208_v26 = vld [vmem:[#allocation2 + $0xc8] sm:$0xff] }
 0x18c   : > { %v1019_v34 = vpop.f32.mrb[63].mxu1  ;;  %2562 = vmatprep.subr.bf16.mxu0 %v2561_v42  ;;  %v2589_v14 = vpack.c.bf16 %v1210_v46, %v1208_v26 }
 0x18d   : > { %1754 = vmatprep.mubr.f32.mxu0 %v1019_v34 }
 0x18e   : > { %1755 = vmatmul.mubr.f32.gmra.mrb[62].mxu0 %v1017_v31  ;;  %v1207_v31 = vld [vmem:[#allocation2 + $0xc0] sm:$0xff] }
 0x18f   : > { %v1088_v41 = vpop.f32.mrb[64].mxu1  ;;  %2564 = vmatpush1.bf16.msra.mxu0 %v2563_v32  ;;  %v1209_v32 = vld [vmem:[#allocation2 + $0xd0] sm:$0xff] }
 0x190   : > { %v3363_v47 = vpop.f32.mrb[0].mxu0  ;;  %v1090_v52 = vpop.f32.mrb[65].mxu1  ;;  %2566 = vmatprep.subr.bf16.mxu0 %v2565_v35  ;;  %v1212_v35 = vld [vmem:[#allocation2 + $0xe8] sm:$0xff]  ;;  %v2591_v33 = vpack.c.bf16 %v1209_v32, %v1207_v31 }
 0x191   : > { %v3365_v51 = vpop.f32.mrb[1].mxu0  ;;  %1825 = vmatprep.mubr.f32.mxu0 %v1090_v52  ;;  %v1211_v52 = vld [vmem:[#allocation2 + $0xe0] sm:$0xff]  ;;  %v1232_v32 = vld [vmem:[#allocation2 + $0x188] sm:$0xff] }
 0x192   : > { %1826 = vmatmul.mubr.f32.vlgmr.msra.gmra.mrb[32].mxu0 %v1088_v41 }
 0x193   : > { %v1094_v57 = vpop.f32.mrb[66].mxu1  ;;  %2568 = vmatpush1.bf16.msra.mxu0 %v2567_v43  ;;  %v2593_v43 = vpack.c.bf16 %v1214_v37, %v1212_v35  ;;  %v1234_v35 = vld [vmem:[#allocation2 + $0x198] sm:$0xff] }
 0x194   : > { %v3367_v59 = vpop.f32.mrb[2].mxu0  ;;  %v1096_v48 = vpop.f32.mrb[67].mxu1  ;;  %2570 = vmatprep.subr.bf16.mxu0 %v2569_v53  ;;  %v1213_v53 = vld [vmem:[#allocation2 + $0xf0] sm:$0xff] }
 0x195   : > { %v3369_v44 = vpop.f32.mrb[3].mxu0  ;;  %1831 = vmatprep.mubr.f32.mxu0 %v1096_v48 }
 0x196   : > { %1832 = vmatmul.mubr.f32.gmra.mrb[34].mxu0 %v1094_v57  ;;  %v2595_v57 = vpack.c.bf16 %v1213_v53, %v1211_v52  ;;  %v1231_v52 = vld [vmem:[#allocation2 + $0x180] sm:$0xff]  ;;  %v1233_v53 = vld [vmem:[#allocation2 + $0x190] sm:$0xff] }
 0x197   : > { %v1100_v3 = vpop.f32.mrb[68].mxu1  ;;  %2572 = vmatpush1.bf16.msra.mxu0 %v2571_v58 }
 0x198   : > { %v3371_v5 = vpop.f32.mrb[4].mxu0  ;;  %v1102_v6 = vpop.f32.mrb[69].mxu1  ;;  %2574 = vmatprep.subr.bf16.mxu0 %v2573_v62  ;;  %v2597_v62 = vpack.c.bf16 %v1218_v19, %v1216_v55  ;;  %v1236_v19 = vld [vmem:[#allocation2 + $0x1a8] sm:$0xff] }
 0x199   : > { %v3373_v0 = vpop.f32.mrb[5].mxu0  ;;  %1837 = vmatprep.mubr.f32.mxu0 %v1102_v6  ;;  %v2599_v6 = vpack.c.bf16 %v1217_v63, %v1215_v36 }
 0x19a   : > { %1838 = vmatmul.mubr.f32.gmra.mrb[36].mxu0 %v1100_v3  ;;  %v1222_v3 = vld [vmem:[#allocation2 + $0x138] sm:$0xff] }
 0x19b   : > { %v1106_v9 = vpop.f32.mrb[70].mxu1  ;;  %2576 = vmatpush1.bf16.msra.mxu0 %v2575_v4  ;;  %v2601_v61 = vpack.c.bf16 %v1222_v3, %v1220_v2  ;;  %v1235_v2 = vld [vmem:[#allocation2 + $0x1a0] sm:$0xff]  ;;  %v1237_v3 = vld [vmem:[#allocation2 + $0x1b0] sm:$0xff] }
 0x19c   : > { %v3375_v11 = vpop.f32.mrb[6].mxu0  ;;  %v1108_v50 = vpop.f32.mrb[71].mxu1  ;;  %2578 = vmatprep.subr.bf16.mxu0 %v2577_v7  ;;  %v2619_v22 = vpack.c.bf16 %v1237_v3, %v1235_v2 }
 0x19d   : > { %v3377_v13 = vpop.f32.mrb[7].mxu0  ;;  %1843 = vmatprep.mubr.f32.mxu0 %v1108_v50  ;;  %v1226_v50 = vld [vmem:[#allocation2 + $0x158] sm:$0xff] }
 0x19e   : > { %1844 = vmatmul.mubr.f32.gmra.mrb[38].mxu0 %v1106_v9 }
 0x19f   : > { %v1112_v17 = vpop.f32.mrb[72].mxu1  ;;  %2580 = vmatpush1.bf16.msra.mxu0 %v2579_v10  ;;  %v1224_v10 = vld [vmem:[#allocation2 + $0x148] sm:$0xff] }
 0x1a0   : > { %v3379_v20 = vpop.f32.mrb[8].mxu0  ;;  %v1114_v21 = vpop.f32.mrb[73].mxu1  ;;  %2582 = vmatprep.subr.bf16.mxu0 %v2581_v39  ;;  %v2605_v16 = vpack.c.bf16 %v1226_v50, %v1224_v10 }
 0x1a1   : > { %v3381_v25 = vpop.f32.mrb[9].mxu0  ;;  %1849 = vmatprep.mubr.f32.mxu0 %v1114_v21 }
 0x1a2   : > { %1850 = vmatmul.mubr.f32.gmra.mrb[40].mxu0 %v1112_v17  ;;  %v1223_v17 = vld [vmem:[#allocation2 + $0x140] sm:$0xff] }
 0x1a3   : > { %v1118_v42 = vpop.f32.mrb[74].mxu1  ;;  %2584 = vmatpush1.bf16.msra.mxu0 %v2583_v18  ;;  %v1225_v18 = vld [vmem:[#allocation2 + $0x150] sm:$0xff] }
 0x1a4   : > { %v3383_v28 = vpop.f32.mrb[10].mxu0  ;;  %v1120_v29 = vpop.f32.mrb[75].mxu1  ;;  %2586 = vmatprep.subr.bf16.mxu0 %v2585_v23  ;;  %v1228_v23 = vld [vmem:[#allocation2 + $0x168] sm:$0xff]  ;;  %v2607_v26 = vpack.c.bf16 %v1225_v18, %v1223_v17  ;;  %v1246_v17 = vld [vmem:[#allocation2 + $0x1f8] sm:$0xff] }
 0x1a5   : > { %v3385_v34 = vpop.f32.mrb[11].mxu0  ;;  %1855 = vmatprep.mubr.f32.mxu0 %v1120_v29  ;;  %v1227_v29 = vld [vmem:[#allocation2 + $0x160] sm:$0xff] }
 0x1a6   : > { %1856 = vmatmul.mubr.f32.gmra.mrb[42].mxu0 %v1118_v42 }
 0x1a7   : > { %v1124_v38 = vpop.f32.mrb[76].mxu1  ;;  %2588 = vmatpush1.bf16.msra.mxu0 %v2587_v27  ;;  %v2609_v27 = vpack.c.bf16 %v1230_v30, %v1228_v23 }
 0x1a8   : > { %v3387_v40 = vpop.f32.mrb[12].mxu0  ;;  %v1126_v41 = vpop.f32.mrb[77].mxu1  ;;  %2590 = vmatprep.subr.bf16.mxu0 %v2589_v14  ;;  %v1229_v14 = vld [vmem:[#allocation2 + $0x170] sm:$0xff] }
 0x1a9   : > { %v3389_v54 = vpop.f32.mrb[13].mxu0  ;;  %1861 = vmatprep.mubr.f32.mxu0 %v1126_v41 }
 0x1aa   : > { %1862 = vmatmul.mubr.f32.gmra.mrb[44].mxu0 %v1124_v38  ;;  %v2611_v38 = vpack.c.bf16 %v1229_v14, %v1227_v29 }
 0x1ab   : > { %v1130_v56 = vpop.f32.mrb[78].mxu1  ;;  %2592 = vmatpush1.bf16.msra.mxu0 %v2591_v33 }
 0x1ac   : > { %v3391_v58 = vpop.f32.mrb[14].mxu0  ;;  %v1132_v48 = vpop.f32.mrb[79].mxu1  ;;  %2594 = vmatprep.subr.bf16.mxu0 %v2593_v43  ;;  %v2613_v43 = vpack.c.bf16 %v1234_v35, %v1232_v32 }
 0x1ad   : > { %v3393_v1 = vpop.f32.mrb[15].mxu0  ;;  %1867 = vmatprep.mubr.f32.mxu0 %v1132_v48  ;;  %v2615_v48 = vpack.c.bf16 %v1233_v53, %v1231_v52 }
 0x1ae   : > { %1868 = vmatmul.mubr.f32.gmra.mrb[46].mxu0 %v1130_v56  ;;  %v1238_v56 = vld [vmem:[#allocation2 + $0x1b8] sm:$0xff] }
 0x1af   : > { %v1136_v4 = vpop.f32.mrb[80].mxu1  ;;  %2596 = vmatpush1.bf16.msra.mxu0 %v2595_v57  ;;  %v2617_v63 = vpack.c.bf16 %v1238_v56, %v1236_v19 }
 0x1b0   : > { %v3395_v7 = vpop.f32.mrb[16].mxu0  ;;  %v1138_v49 = vpop.f32.mrb[81].mxu1  ;;  %2598 = vmatprep.subr.bf16.mxu0 %v2597_v62 }
 0x1b1   : > { %v3397_v9 = vpop.f32.mrb[17].mxu0  ;;  %1873 = vmatprep.mubr.f32.mxu0 %v1138_v49  ;;  %v1242_v49 = vld [vmem:[#allocation2 + $0x1d8] sm:$0xff] }
 0x1b2   : > { %1874 = vmatmul.mubr.f32.gmra.mrb[48].mxu0 %v1136_v4 }
 0x1b3   : > { %v1142_v39 = vpop.f32.mrb[82].mxu1  ;;  %2600 = vmatpush1.bf16.msra.mxu0 %v2599_v6  ;;  %v1240_v6 = vld [vmem:[#allocation2 + $0x1c8] sm:$0xff] }
 0x1b4   : > { %v3399_v12 = vpop.f32.mrb[18].mxu0  ;;  %v1144_v15 = vpop.f32.mrb[83].mxu1  ;;  %2602 = vmatprep.subr.bf16.mxu0 %v2601_v61  ;;  %v2621_v50 = vpack.c.bf16 %v1242_v49, %v1240_v6 }
 0x1b5   : > { %v3401_v21 = vpop.f32.mrb[19].mxu0  ;;  %1879 = vmatprep.mubr.f32.mxu0 %v1144_v15 }
 0x1b6   : > { %1880 = vmatmul.mubr.f32.gmra.mrb[50].mxu0 %v1142_v39  ;;  %v1239_v39 = vld [vmem:[#allocation2 + $0x1c0] sm:$0xff] }
 0x1b7   : > { %v1148_v24 = vpop.f32.mrb[84].mxu1  ;;  %2604 = vmatpush1.bf16.msra.mxu0 %v2603_v45  ;;  %v1241_v45 = vld [vmem:[#allocation2 + $0x1d0] sm:$0xff] }
 0x1b8   : > { %v3403_v46 = vpop.f32.mrb[20].mxu0  ;;  %v1150_v42 = vpop.f32.mrb[85].mxu1  ;;  %2606 = vmatprep.subr.bf16.mxu0 %v2605_v16  ;;  %v1244_v16 = vld [vmem:[#allocation2 + $0x1e8] sm:$0xff]  ;;  %v2623_v23 = vpack.c.bf16 %v1241_v45, %v1239_v39 }
 0x1b9   : > { %v3405_v31 = vpop.f32.mrb[21].mxu0  ;;  %1885 = vmatprep.mubr.f32.mxu0 %v1150_v42  ;;  %v1243_v42 = vld [vmem:[#allocation2 + $0x1e0] sm:$0xff] }
 0x1ba   : > { %1886 = vmatmul.mubr.f32.gmra.mrb[52].mxu0 %v1148_v24 }
 0x1bb   : > { %v1154_v37 = vpop.f32.mrb[86].mxu1  ;;  %2608 = vmatpush1.bf16.msra.mxu0 %v2607_v26  ;;  %v2625_v26 = vpack.c.bf16 %v1246_v17, %v1244_v16 }
 0x1bc   : > { %v3407_v33 = vpop.f32.mrb[22].mxu0  ;;  %v1156_v41 = vpop.f32.mrb[87].mxu1  ;;  %2610 = vmatprep.subr.bf16.mxu0 %v2609_v27  ;;  %v1245_v27 = vld [vmem:[#allocation2 + $0x1f0] sm:$0xff] }
 0x1bd   : > { %v3409_v55 = vpop.f32.mrb[23].mxu0  ;;  %1891 = vmatprep.mubr.f32.mxu0 %v1156_v41  ;;  %v2627_v32 = vpack.c.bf16 %v1245_v27, %v1243_v42 }
 0x1be   : > { %1892 = vmatmul.mubr.f32.gmra.mrb[54].mxu0 %v1154_v37 }
 0x1bf   : > { %v1160_v57 = vpop.f32.mrb[88].mxu1  ;;  %2612 = vmatpush1.bf16.msra.mxu0 %v2611_v38 }
 0x1c0   : > { %v3411_v62 = vpop.f32.mrb[24].mxu0  ;;  %v1162_v36 = vpop.f32.mrb[89].mxu1  ;;  %2614 = vmatprep.subr.bf16.mxu0 %v2613_v43 }
 0x1c1   : > { %v3413_v4 = vpop.f32.mrb[25].mxu0  ;;  %1897 = vmatprep.mubr.f32.mxu0 %v1162_v36 }
 0x1c2   : > { %1898 = vmatmul.mubr.f32.gmra.mrb[56].mxu0 %v1160_v57 }
 0x1c3   : > { %v1166_v61 = vpop.f32.mrb[90].mxu1  ;;  %2616 = vmatpush1.bf16.msra.mxu0 %v2615_v48 }
 0x1c4   : > { %v3415_v8 = vpop.f32.mrb[26].mxu0  ;;  %v1168_v10 = vpop.f32.mrb[91].mxu1  ;;  %2618 = vmatprep.subr.bf16.mxu0 %v2617_v63  ;;  %v2083_v63 = vld [vmem:[%s3677_s5] sm:$0x3] }
 0x1c5   : > { %v3417_v15 = vpop.f32.mrb[27].mxu0  ;;  %1903 = vmatprep.mubr.f32.mxu0 %v1168_v10 }
 0x1c6   : > { %1904 = vmatmul.mubr.f32.gmra.mrb[58].mxu0 %v1166_v61 }
 0x1c7   : > { %v1172_v18 = vpop.f32.mrb[92].mxu1  ;;  %2620 = vmatpush1.bf16.msra.mxu0 %v2619_v22 }
 0x1c8   : > { %v3419_v30 = vpop.f32.mrb[28].mxu0  ;;  %v1174_v24 = vpop.f32.mrb[93].mxu1  ;;  %2622 = vmatprep.subr.bf16.mxu0 %v2621_v50 }
 0x1c9   : > { %v614_v29 = vpop.f32.mrb[29].mxu0  ;;  %1909 = vmatprep.mubr.f32.mxu0 %v1174_v24 }
 0x1ca   : > { %1910 = vmatmul.mubr.f32.gmra.mrb[60].mxu0 %v1172_v18 }
 0x1cb   : > { %v1178_v14 = vpop.f32.mrb[94].mxu1  ;;  %2624 = vmatpush1.bf16.msra.mxu0 %v2623_v23 }
 0x1cc   : > { %v618_v35 = vpop.f32.mrb[30].mxu0  ;;  %v1180_v37 = vpop.f32.mrb[95].mxu1  ;;  %2626 = vmatprep.subr.bf16.mxu0 %v2625_v26 }
 0x1cd   : > { %v620_v38 = vpop.f32.mrb[31].mxu0  ;;  %1915 = vmatprep.mubr.f32.mxu0 %v1180_v37 }
 0x1ce   : > { %1916 = vmatmul.mubr.f32.gmra.mrb[62].mxu0 %v1178_v14 }
 0x1cf   : > { %2628 = vmatpush1.bf16.msra.mxu0 %v2627_v32  ;;  %1986 = vmatprep.mubr.f32.mxu0 %v3365_v51 }
 0x1d2   : > { %1987 = vmatmul.mubr.f32.vlgmr.msra.gmra.mrb[32].mxu0 %v3363_v47 }
 0x1d3   : > { %1992 = vmatprep.mubr.f32.mxu0 %v3369_v44 }
 0x1d6   : > { %1993 = vmatmul.mubr.f32.gmra.mrb[34].mxu0 %v3367_v59 }
 0x1d7   : > { %1998 = vmatprep.mubr.f32.mxu0 %v3373_v0 }
 0x1da   : > { %1999 = vmatmul.mubr.f32.gmra.mrb[36].mxu0 %v3371_v5 }
 0x1db   : > { %2004 = vmatprep.mubr.f32.mxu0 %v3377_v13 }
 0x1de   : > { %2005 = vmatmul.mubr.f32.gmra.mrb[38].mxu0 %v3375_v11 }
 0x1df   : > { %2010 = vmatprep.mubr.f32.mxu0 %v3381_v25 }
 0x1e2   : > { %2011 = vmatmul.mubr.f32.gmra.mrb[40].mxu0 %v3379_v20 }
 0x1e3   : > { %2016 = vmatprep.mubr.f32.mxu0 %v3385_v34 }
 0x1e5   : > { %v1505_v51 = vpop.f32.mrb[96].mxu1 }
 0x1e6   : > { %v3432_v47 = vpop.f32.mrb[97].mxu1  ;;  %2017 = vmatmul.mubr.f32.gmra.mrb[42].mxu0 %v3383_v28 }
 0x1e7   : > { %2022 = vmatprep.mubr.f32.mxu0 %v3389_v54 }
 0x1e9   : > { %v3436_v59 = vpop.f32.mrb[98].mxu1 }
 0x1ea   : > { %v3438_v44 = vpop.f32.mrb[99].mxu1  ;;  %2023 = vmatmul.mubr.f32.gmra.mrb[44].mxu0 %v3387_v40 }
 0x1eb   : > { %2028 = vmatprep.mubr.f32.mxu0 %v3393_v1 }
 0x1ed   : > { %v3442_v5 = vpop.f32.mrb[100].mxu1 }
 0x1ee   : > { %v3444_v0 = vpop.f32.mrb[101].mxu1  ;;  %2029 = vmatmul.mubr.f32.gmra.mrb[46].mxu0 %v3391_v58 }
 0x1ef   : > { %2034 = vmatprep.mubr.f32.mxu0 %v3397_v9 }
 0x1f1   : > { %v3448_v11 = vpop.f32.mrb[102].mxu1 }
 0x1f2   : > { %v3450_v13 = vpop.f32.mrb[103].mxu1  ;;  %2035 = vmatmul.mubr.f32.gmra.mrb[48].mxu0 %v3395_v7 }
 0x1f3   : > { %2040 = vmatprep.mubr.f32.mxu0 %v3401_v21 }
 0x1f5   : > { %v3454_v20 = vpop.f32.mrb[104].mxu1 }
 0x1f6   : > { %v3456_v25 = vpop.f32.mrb[105].mxu1  ;;  %2041 = vmatmul.mubr.f32.gmra.mrb[50].mxu0 %v3399_v12 }
 0x1f7   : > { %2046 = vmatprep.mubr.f32.mxu0 %v3405_v31 }
 0x1f9   : > { %v3460_v28 = vpop.f32.mrb[106].mxu1 }
 0x1fa   : > { %v3462_v34 = vpop.f32.mrb[107].mxu1  ;;  %2047 = vmatmul.mubr.f32.gmra.mrb[52].mxu0 %v3403_v46 }
 0x1fb   : > { %2052 = vmatprep.mubr.f32.mxu0 %v3409_v55 }
 0x1fd   : > { %v3466_v40 = vpop.f32.mrb[108].mxu1 }
 0x1fe   : > { %v3468_v54 = vpop.f32.mrb[109].mxu1  ;;  %2053 = vmatmul.mubr.f32.gmra.mrb[54].mxu0 %v3407_v33 }
 0x1ff   : > { %2058 = vmatprep.mubr.f32.mxu0 %v3413_v4 }
 0x201   : > { %v3472_v58 = vpop.f32.mrb[110].mxu1 }
 0x202   : > { %v3474_v1 = vpop.f32.mrb[111].mxu1  ;;  %2059 = vmatmul.mubr.f32.gmra.mrb[56].mxu0 %v3411_v62  ;;  %v2086_v62 = vshrl.u32 %v306_v60, 7 }
 0x203   : > { %2064 = vmatprep.mubr.f32.mxu0 %v3417_v15 }
 0x204   : > { %v2087_v36 = vsub.s32 0, %v2086_v62  ;;  %v2091_v2 = vsub.s32 1, %v2086_v62 }
 0x205   : > { %v3478_v7 = vpop.f32.mrb[112].mxu1 }
 0x206   : > { %v3480_v9 = vpop.f32.mrb[113].mxu1  ;;  %2065 = vmatmul.mubr.f32.gmra.mrb[58].mxu0 %v3415_v8  ;;  %v3519_v3 = vrot.slane %v2083_v63, %v2087_v36  ;;  %v3521_v6 = vrot.slane %v2083_v63, %v2091_v2 }
 0x207   : > { %2070 = vmatprep.mubr.f32.mxu0 %v614_v29 }
 0x209   : > { %v3483_v12 = vpop.f32.mrb[114].mxu1 }
 0x20a   : > { %v3485_v21 = vpop.f32.mrb[115].mxu1  ;;  %2071 = vmatmul.mubr.f32.gmra.mrb[60].mxu0 %v3419_v30 }
 0x20b   : > { %2076 = vmatprep.mubr.f32.mxu0 %v620_v38 }
 0x20d   : > { %v3488_v46 = vpop.f32.mrb[116].mxu1 }
 0x20e   : > { %v3490_v31 = vpop.f32.mrb[117].mxu1  ;;  %2077 = vmatmul.mubr.f32.gmra.mrb[62].mxu0 %v618_v35 }
 0x211   : > { %v3492_v33 = vpop.f32.mrb[118].mxu1 }
 0x212   : > { %v3494_v41 = vpop.f32.mrb[119].mxu1 }
 0x215   : > { %v3496_v43 = vpop.f32.mrb[120].mxu1 }
 0x216   : > { %v3498_v52 = vpop.f32.mrb[121].mxu1 }
 0x219   : > { %v3500_v53 = vpop.f32.mrb[122].mxu1 }
 0x21a   : > { %v3502_v55 = vpop.f32.mrb[123].mxu1 }
 0x21d   : > { %v3504_v19 = vpop.f32.mrb[124].mxu1 }
 0x21e   : > { %v3506_v56 = vpop.f32.mrb[125].mxu1 }
 0x221   : > { %v3508_v57 = vpop.f32.mrb[126].mxu1 }
 0x222   : > { %v3510_v48 = vpop.f32.mrb[127].mxu1 }
 0x2a5   : > { %v1988_v4 = vpop.f32.mrb[32].mxu0 }
 0x2a6   : > { %v2629_v49 = vadd.f32 %v1988_v4, %v1505_v51  ;;  %v1990_v61 = vpop.f32.mrb[33].mxu0 }
 0x2a7   : > { %v2630_v22 = vadd.f32 %v1990_v61, %v3432_v47 }
 0x2a8   : > { %v2095_v60 = vadd.f32 %v2629_v49, %v3519_v3 }
 0x2a9   : > { %v2096_v8 = vadd.f32 %v2630_v22, %v3521_v6  ;;  %v1994_v10 = vpop.f32.mrb[34].mxu0 }
 0x2aa   : > { %2127 = vst [vmem:[%s3526_s26] sm:$0xff] %v2095_v60  ;;  %v2631_v50 = vadd.f32 %v1994_v10, %v3436_v59  ;;  %v1996_v39 = vpop.f32.mrb[35].mxu0 }
 0x2ab   : > { %2128 = vst [vmem:[%s3526_s26 + $0x8] sm:$0xff] %v2096_v8  ;;  %v2632_v45 = vadd.f32 %v1996_v39, %v3438_v44 }
 0x2ac   : > { %v2097_v15 = vadd.f32 %v2631_v50, %v3519_v3 }
 0x2ad   : > { %v2098_v16 = vadd.f32 %v2632_v45, %v3521_v6  ;;  %v2000_v17 = vpop.f32.mrb[36].mxu0 }
 0x2ae   : > { %2129 = vst [vmem:[%s3526_s26 + $0x10] sm:$0xff] %v2097_v15  ;;  %v2633_v18 = vadd.f32 %v2000_v17, %v3442_v5  ;;  %v2002_v23 = vpop.f32.mrb[37].mxu0 }
 0x2af   : > { %2130 = vst [vmem:[%s3526_s26 + $0x18] sm:$0xff] %v2098_v16  ;;  %v2634_v30 = vadd.f32 %v2002_v23, %v3444_v0 }
 0x2b0   : > { %v2099_v24 = vadd.f32 %v2633_v18, %v3519_v3 }
 0x2b1   : > { %v2100_v26 = vadd.f32 %v2634_v30, %v3521_v6  ;;  %v2006_v42 = vpop.f32.mrb[38].mxu0 }
 0x2b2   : > { %2131 = vst [vmem:[%s3526_s26 + $0x20] sm:$0xff] %v2099_v24  ;;  %v2635_v27 = vadd.f32 %v2006_v42, %v3448_v11  ;;  %v2008_v29 = vpop.f32.mrb[39].mxu0 }
 0x2b3   : > { %2132 = vst [vmem:[%s3526_s26 + $0x28] sm:$0xff] %v2100_v26  ;;  %v2636_v14 = vadd.f32 %v2008_v29, %v3450_v13 }
 0x2b4   : > { %v2101_v32 = vadd.f32 %v2635_v27, %v3519_v3 }
 0x2b5   : > { %v2102_v35 = vadd.f32 %v2636_v14, %v3521_v6  ;;  %v2012_v37 = vpop.f32.mrb[40].mxu0 }
 0x2b6   : > { %2133 = vst [vmem:[%s3526_s26 + $0x30] sm:$0xff] %v2101_v32  ;;  %v2637_v38 = vadd.f32 %v2012_v37, %v3454_v20  ;;  %v2014_v51 = vpop.f32.mrb[41].mxu0 }
 0x2b7   : > { %2134 = vst [vmem:[%s3526_s26 + $0x38] sm:$0xff] %v2102_v35  ;;  %v2638_v47 = vadd.f32 %v2014_v51, %v3456_v25 }
 0x2b8   : > { %v2103_v59 = vadd.f32 %v2637_v38, %v3519_v3 }
 0x2b9   : > { %v2104_v44 = vadd.f32 %v2638_v47, %v3521_v6  ;;  %v2018_v5 = vpop.f32.mrb[42].mxu0 }
 0x2ba   : > { %2135 = vst [vmem:[%s3526_s26 + $0x40] sm:$0xff] %v2103_v59  ;;  %v2639_v0 = vadd.f32 %v2018_v5, %v3460_v28  ;;  %v2020_v11 = vpop.f32.mrb[43].mxu0 }
 0x2bb   : > { %2136 = vst [vmem:[%s3526_s26 + $0x48] sm:$0xff] %v2104_v44  ;;  %v2640_v13 = vadd.f32 %v2020_v11, %v3462_v34 }
 0x2bc   : > { %v2105_v20 = vadd.f32 %v2639_v0, %v3519_v3 }
 0x2bd   : > { %v2106_v62 = vadd.f32 %v2640_v13, %v3521_v6  ;;  %v2024_v36 = vpop.f32.mrb[44].mxu0 }
 0x2be   : > { %2137 = vst [vmem:[%s3526_s26 + $0x50] sm:$0xff] %v2105_v20  ;;  %v2641_v25 = vadd.f32 %v2024_v36, %v3466_v40  ;;  %v2026_v63 = vpop.f32.mrb[45].mxu0 }
 0x2bf   : > { %2138 = vst [vmem:[%s3526_s26 + $0x58] sm:$0xff] %v2106_v62  ;;  %v2642_v2 = vadd.f32 %v2026_v63, %v3468_v54 }
 0x2c0   : > { %v2107_v28 = vadd.f32 %v2641_v25, %v3519_v3 }
 0x2c1   : > { %v2108_v4 = vadd.f32 %v2642_v2, %v3521_v6  ;;  %v2030_v49 = vpop.f32.mrb[46].mxu0 }
 0x2c2   : > { %2139 = vst [vmem:[%s3526_s26 + $0x60] sm:$0xff] %v2107_v28  ;;  %v2643_v34 = vadd.f32 %v2030_v49, %v3472_v58  ;;  %v2032_v61 = vpop.f32.mrb[47].mxu0 }
 0x2c3   : > { %2140 = vst [vmem:[%s3526_s26 + $0x68] sm:$0xff] %v2108_v4  ;;  %v2644_v22 = vadd.f32 %v2032_v61, %v3474_v1 }
 0x2c4   : > { %v2109_v40 = vadd.f32 %v2643_v34, %v3519_v3 }
 0x2c5   : > { %v2110_v60 = vadd.f32 %v2644_v22, %v3521_v6  ;;  %v2036_v8 = vpop.f32.mrb[48].mxu0 }
 0x2c6   : > { %2141 = vst [vmem:[%s3526_s26 + $0x70] sm:$0xff] %v2109_v40  ;;  %v2645_v54 = vadd.f32 %v2036_v8, %v3478_v7  ;;  %v2038_v10 = vpop.f32.mrb[49].mxu0 }
 0x2c7   : > { %2142 = vst [vmem:[%s3526_s26 + $0x78] sm:$0xff] %v2110_v60  ;;  %v2646_v50 = vadd.f32 %v2038_v10, %v3480_v9 }
 0x2c8   : > { %v2111_v58 = vadd.f32 %v2645_v54, %v3519_v3 }
 0x2c9   : > { %v2112_v39 = vadd.f32 %v2646_v50, %v3521_v6  ;;  %v2042_v45 = vpop.f32.mrb[50].mxu0 }
 0x2ca   : > { %2143 = vst [vmem:[%s3526_s26 + $0x80] sm:$0xff] %v2111_v58  ;;  %v2647_v1 = vadd.f32 %v2042_v45, %v3483_v12  ;;  %v2044_v15 = vpop.f32.mrb[51].mxu0 }
 0x2cb   : > { %2144 = vst [vmem:[%s3526_s26 + $0x88] sm:$0xff] %v2112_v39  ;;  %v2648_v16 = vadd.f32 %v2044_v15, %v3485_v21 }
 0x2cc   : > { %v2113_v7 = vadd.f32 %v2647_v1, %v3519_v3 }
 0x2cd   : > { %v2114_v17 = vadd.f32 %v2648_v16, %v3521_v6  ;;  %v2048_v18 = vpop.f32.mrb[52].mxu0 }
 0x2ce   : > { %2145 = vst [vmem:[%s3526_s26 + $0x90] sm:$0xff] %v2113_v7  ;;  %v2649_v9 = vadd.f32 %v2048_v18, %v3488_v46  ;;  %v2050_v23 = vpop.f32.mrb[53].mxu0 }
 0x2cf   : > { %2146 = vst [vmem:[%s3526_s26 + $0x98] sm:$0xff] %v2114_v17  ;;  %v2650_v30 = vadd.f32 %v2050_v23, %v3490_v31 }
 0x2d0   : > { %v2115_v12 = vadd.f32 %v2649_v9, %v3519_v3 }
 0x2d1   : > { %v2116_v24 = vadd.f32 %v2650_v30, %v3521_v6  ;;  %v2054_v26 = vpop.f32.mrb[54].mxu0 }
 0x2d2   : > { %2147 = vst [vmem:[%s3526_s26 + $0xa0] sm:$0xff] %v2115_v12  ;;  %v2651_v21 = vadd.f32 %v2054_v26, %v3492_v33  ;;  %v2056_v42 = vpop.f32.mrb[55].mxu0 }
 0x2d3   : > { %2148 = vst [vmem:[%s3526_s26 + $0xa8] sm:$0xff] %v2116_v24  ;;  %v2652_v27 = vadd.f32 %v2056_v42, %v3494_v41 }
 0x2d4   : > { %v2117_v46 = vadd.f32 %v2651_v21, %v3519_v3 }
 0x2d5   : > { %v2118_v29 = vadd.f32 %v2652_v27, %v3521_v6  ;;  %v2060_v14 = vpop.f32.mrb[56].mxu0 }
 0x2d6   : > { %2149 = vst [vmem:[%s3526_s26 + $0xb0] sm:$0xff] %v2117_v46  ;;  %v2653_v31 = vadd.f32 %v2060_v14, %v3496_v43  ;;  %v2062_v32 = vpop.f32.mrb[57].mxu0 }
 0x2d7   : > { %2150 = vst [vmem:[%s3526_s26 + $0xb8] sm:$0xff] %v2118_v29  ;;  %v2654_v35 = vadd.f32 %v2062_v32, %v3498_v52 }
 0x2d8   : > { %v2119_v33 = vadd.f32 %v2653_v31, %v3519_v3 }
 0x2d9   : > { %v2120_v37 = vadd.f32 %v2654_v35, %v3521_v6  ;;  %v2066_v38 = vpop.f32.mrb[58].mxu0 }
 0x2da   : > { %2151 = vst [vmem:[%s3526_s26 + $0xc0] sm:$0xff] %v2119_v33  ;;  %v2655_v41 = vadd.f32 %v2066_v38, %v3500_v53  ;;  %v2068_v51 = vpop.f32.mrb[59].mxu0 }
 0x2db   : > { %2152 = vst [vmem:[%s3526_s26 + $0xc8] sm:$0xff] %v2120_v37  ;;  %v2656_v43 = vadd.f32 %v2068_v51, %v3502_v55 }
 0x2dc   : > { %v2121_v47 = vadd.f32 %v2655_v41, %v3519_v3 }
 0x2dd   : > { %v2122_v52 = vadd.f32 %v2656_v43, %v3521_v6  ;;  %v2072_v59 = vpop.f32.mrb[60].mxu0 }
 0x2de   : > { %2153 = vst [vmem:[%s3526_s26 + $0xd0] sm:$0xff] %v2121_v47  ;;  %v2657_v44 = vadd.f32 %v2072_v59, %v3504_v19  ;;  %v2074_v5 = vpop.f32.mrb[61].mxu0 }
 0x2df   : > { %2154 = vst [vmem:[%s3526_s26 + $0xd8] sm:$0xff] %v2122_v52  ;;  %v2658_v53 = vadd.f32 %v2074_v5, %v3506_v56 }
 0x2e0   : > { %v2123_v0 = vadd.f32 %v2657_v44, %v3519_v3 }
 0x2e1   : > { %v2124_v55 = vadd.f32 %v2658_v53, %v3521_v6  ;;  %v2078_v11 = vpop.f32.mrb[62].mxu0 }
 0x2e2   : > { %2155 = vst [vmem:[%s3526_s26 + $0xe0] sm:$0xff] %v2123_v0  ;;  %v2659_v13 = vadd.f32 %v2078_v11, %v3508_v57  ;;  %v2080_v20 = vpop.f32.mrb[63].mxu0 }
 0x2e3   : > { %2156 = vst [vmem:[%s3526_s26 + $0xe8] sm:$0xff] %v2124_v55  ;;  %v2660_v19 = vadd.f32 %v2080_v20, %v3510_v48 }
 0x2e4   : > { %v2125_v62 = vadd.f32 %v2659_v13, %v3519_v3 }
 0x2e5   : > { %v2126_v56 = vadd.f32 %v2660_v19, %v3521_v6 }
 0x2e6   : > { %2157 = vst [vmem:[%s3526_s26 + $0xf0] sm:$0xff] %v2125_v62 }
 0x2e7   : > { %2158 = vst [vmem:[%s3526_s26 + $0xf8] sm:$0xff] %v2126_v56 }
 0x2e8   : > { %2824 = shalt.err (!%p2821_p7)
}
 0x2e9   : > { %s2825_s17 = scalar_lea.hbm %s3622_s12, 4096  ;;  %s2829_s19 = scalar_lea.hbm %s3678_s6, 8192 }
 0x2ea   : > { %p2826_p8 = scmp.ne.s32.totalorder %s3622_s12, %s2825_s17  ;;  %p2830_p1 = scmp.lt.u32.totalorder %s3622_s12, %s3678_s6 }
 0x2eb   : > { %p2831_p0 = scmp.lt.u32.totalorder %s2829_s19, %s2825_s17  ;;  %p2833_p6 = scmp.lt.u32.totalorder %s2825_s17, %s3622_s12 }
 0x2ec   : > { %p2827_p11 = pnand %p2826_p8, %p3689_p9 }
 0x2ed   : > { %p2832_p5 = por %p2831_p0, %p2830_p1 }
 0x2ee   : > { %p2828_p13 = pneg %p2827_p11 }
 0x2ef   : > { %p2834_p10 = por %p2833_p6, %p2832_p5 }
 0x2f1   : > { %p2835_p12 = pnand %p2834_p10, %p2828_p13 }
 0x2f3   : > { %2838 = shalt.err (!%p2835_p12)
}
 0x2f4   : > { %s2885_s28 = smov 256   ;;  %s2886_s10 = smov 16  }
 0x2f5   : > { %2729 = dma.vmem_to_hbm [thread:$0]  (%p3689_p9), %s3624_s29, 4096, %s3622_s12, %s3631_s25, %s2885_s28, %s2885_s28, %s2886_s10  }
 0x2f6 PF: > { %p2741_p2 = scmp.ge.s32.totalorder %s2877_s24, 2  ;;  %s2189_s11 = sand.u32 1, %s2865_s21  }
 0x2f7   : > { %p3690_p3 = scmp.ne.s32.totalorder %s3683_s8, 0  ;;  %s2190_s14 = scalar_lea.sflag [#allocation4], %s2189_s11 }
 0x2f9   : > { %p2736_p4 = pnand %p2741_p2, %p3690_p3 }
 0x2fb   : > { %2860 = dma.done.wait (!%p2736_p4), %s2190_s14, 4096  }
 0x2fc   : > { %2862 = vsyncadd (!%p2736_p4), %s2190_s14, 4294963200  ;;  %p17_p7 = scmp.ge.s32.totalorder %s2947_s27, 4   ;;  %s3691_s21 = smov %s2869_s22 }
 0x2fd   : > { %s3692_s22 = smov %s2873_s23  ;;  %s3693_s23 = smov %s2958_s30 }
 0x2fe   : > { %s3694_s24 = smov %s2947_s27  ;;  %19 = sbr.rel (!%p17_p7) target bundleno = 4 (0x4), region = 87 }
 0x305   :  { %2195 = vsyncpa [#allocation3], 1 }
 0x306   :  { %2197 = vsyncpa [#allocation3 + $0x1], 1 }
 0x307   :  { %2198 = vsyncpa [#allocation4], 1 }
 0x308   :  { %2200 = vsyncpa [#allocation4 + $0x1], 1 }

</bundles_post_ra>
